<compile_context>
chip_gen: v7x
topology: tpu7x:2x2x1
jax: 0.10.0
libtpu: 0.0.40
codegen_flags: <defaults>
</compile_context>

<pallas_src>
import numpy as np
import jax
import jax.numpy as jnp
from jax.experimental import pallas as pl
from jax.experimental.pallas import tpu as pltpu

_MAX_DFT_N = 512                              # above this, fall back to jnp.fft
_PRECISION = jax.lax.Precision.HIGHEST        # full-f32 MXU passes (accuracy)


def _angular_spectrum_kernel(x_ref, m_in_ref, fl_ref, hc_ref, gl_ref,
                             m_out_ref, o_ref):
    """Full angular-spectrum propagation of one field, all on the MXU.

    Complex (n, n) maps travel as split real (n, 2n) = [re | im].

      x_ref    : (1, n, 2n) f32   input field, split layout
      m_in_ref : (2n, 2n)   f32   right-DFT   [[Fr, Fi], [-Fi, Fr]]
      fl_ref   : (2n, n)    f32   left-DFT    [Fr ; Fi]
      hc_ref   : (2, n, 2n) f32   transfer fn [Hr | Hr] and [-Hi | Hi]
      gl_ref   : (2n, n)    f32   left-IDFT   [Gr ; Gi]
      m_out_ref: (2n, 2n)   f32   right-IDFT  [[Gr, Gi], [-Gi, Gr]]
      o_ref    : (1, n, 2n) f32   output field, split layout
    """
    n2 = x_ref.shape[2]
    n = n2 // 2
    v = x_ref[0]                                      # (n, 2n) = [xr | xi]

    # -1 on the real half, +1 on the imag half: builds the cross terms of the
    # left-side complex matmuls after a half-width lane roll.
    lane = jax.lax.broadcasted_iota(jnp.int32, (n, n2), 1)
    sign = jnp.where(lane < n, -1.0, 1.0).astype(jnp.float32)

    def dot(a, b):
        return jnp.dot(a, b, preferred_element_type=jnp.float32,
                       precision=_PRECISION)

    def swap_halves(a):                               # [A | B] -> [B | A]
        return pltpu.roll(a, shift=n, axis=1)

    # T1 = x @ F            (one real matmul; complex structure folded in m_in)
    t1 = dot(v, m_in_ref[...])
    # T2 = F @ T1           (two real matmuls + lane roll + sign)
    ft = dot(fl_ref[...], t1)                         # (2n, 2n): [Fr@T1 ; Fi@T1]
    t2 = ft[:n, :] + swap_halves(ft[n:, :]) * sign
    # S = H .* T2           (elementwise complex multiply in split layout)
    s = hc_ref[0] * t2 + hc_ref[1] * swap_halves(t2)
    # T3 = G @ S
    gt = dot(gl_ref[...], s)
    t3 = gt[:n, :] + swap_halves(gt[n:, :]) * sign
    # out = T3 @ G
    o_ref[0] = dot(t3, m_out_ref[...]).astype(o_ref.dtype)


def _propagate_pallas(xs, m_in, fl, hc, gl, m_out):
    """xs: (B, n, 2n) f32 split fields -> (B, n, 2n) f32 split outputs."""
    B, n, n2 = xs.shape
    return pl.pallas_call(
        _angular_spectrum_kernel,
        out_shape=jax.ShapeDtypeStruct((B, n, n2), jnp.float32),
        grid=(B,),
        in_specs=[
            pl.BlockSpec((1, n, n2), lambda b: (b, 0, 0)),   # field (per step)
            pl.BlockSpec((n2, n2), lambda b: (0, 0)),        # constants: block
            pl.BlockSpec((n2, n), lambda b: (0, 0)),         # index fixed ->
            pl.BlockSpec((2, n, n2), lambda b: (0, 0, 0)),   # DMA'd once
            pl.BlockSpec((n2, n), lambda b: (0, 0)),
            pl.BlockSpec((n2, n2), lambda b: (0, 0)),
        ],
        out_specs=pl.BlockSpec((1, n, n2), lambda b: (b, 0, 0)),
        input_output_aliases={0: 0},          # overwrite the field in place
        compiler_params=pltpu.CompilerParams(
            dimension_semantics=("parallel",)),
    )(xs, m_in, fl, hc, gl, m_out)


@jax.jit
def _propagate(x, m_in, fl, hc, gl, m_out):
    """x: complex64 (B, n, n). Full angular-spectrum propagation (one kernel)."""
    _, n, _ = x.shape
    xs = jnp.concatenate([jnp.real(x), jnp.imag(x)], axis=-1)   # (B, n, 2n) f32
    out = _propagate_pallas(xs, m_in, fl, hc, gl, m_out)
    return jax.lax.complex(out[..., :n], out[..., n:])


@jax.jit
def _propagate_fft(x, h):
    # TODO(synk): large-n fallback keeps the 2-D FFT/IFFT in XLA.
    return jnp.fft.ifft2(jnp.fft.fft2(x) * h[None])


class InputDiffractiveLayer:
    """JAX/Pallas analogue of pyonn's InputDiffractiveLayer (forward pass)."""

    def __init__(self, n_size, x_coordinates, y_coordinates, z_coordinate,
                 z_next, wavelength, key=None):
        self.n_size = n_size
        self.x_coordinates = np.asarray(x_coordinates)
        self.y_coordinates = np.asarray(y_coordinates)
        self.z_coordinate = float(z_coordinate)
        self.z_next = float(z_next)
        self.wavelength = float(wavelength)
        self.weights_static = None
        self.output_map = None

        # Base-class parity: random complex weights normalized by max |w|.
        # (InputDiffractiveLayer never uses them in its forward pass.)
        if key is None:
            key = jax.random.PRNGKey(0)
        kr, ki = jax.random.split(key)
        scale = 1.0 / np.sqrt(2.0)   # torch.randn(complex64): re/im ~ N(0, 1/2)
        w_re = jax.random.normal(kr, (n_size, n_size), jnp.float32) * scale
        w_im = jax.random.normal(ki, (n_size, n_size), jnp.float32) * scale
        max_abs = jnp.max(jnp.sqrt(w_re * w_re + w_im * w_im))
        self.w_re = w_re / max_abs
        self.w_im = w_im / max_abs

        # Angular-spectrum transfer function H(fx, fy) for d = z_next - z.
        # Precomputed once in float64 (depends only on layer constants).
        # NOTE: y sampling interval is assumed equal to dx (matches pyonn's
        # propagate_complex_amplitude_map, which only takes x_coordinates).
        dx = float(self.x_coordinates[1] - self.x_coordinates[0])
        f = np.fft.fftfreq(n_size, d=dx)
        fxx, fyy = np.meshgrid(f, f, indexing="ij")
        kz_sq = 1.0 / self.wavelength ** 2 - fxx ** 2 - fyy ** 2
        propagating = kz_sq > 0.0
        kz = 2.0 * np.pi * np.sqrt(np.maximum(kz_sq, 0.0))
        distance = self.z_next - self.z_coordinate
        h = np.where(propagating, np.exp(1j * kz * distance), 0.0)
        hr = np.real(h).astype(np.float64)
        hi = np.imag(h).astype(np.float64)
        self.h_re = jnp.asarray(hr, jnp.float32)
        self.h_im = jnp.asarray(hi, jnp.float32)
        self.h_complex = jnp.asarray(h, jnp.complex64)   # large-n fallback

        # DFT constants for the single-kernel path (float64 host precompute).
        k = np.arange(n_size)
        ang = -2.0 * np.pi * np.outer(k, k) / n_size
        fr, fi = np.cos(ang), np.sin(ang)          # F  = DFT matrix (symmetric)
        gr, gi = fr / n_size, -fi / n_size         # G  = conj(F) / n
        # Right-side complex matmuls folded into single real (2n, 2n) matrices.
        self.m_in = jnp.asarray(np.block([[fr, fi], [-fi, fr]]), jnp.float32)
        self.m_out = jnp.asarray(np.block([[gr, gi], [-gi, gr]]), jnp.float32)
        # Left-side complex matmuls: stacked [real ; imag] (2n, n) factors.
        self.fl = jnp.asarray(np.vstack([fr, fi]), jnp.float32)
        self.gl = jnp.asarray(np.vstack([gr, gi]), jnp.float32)
        # Transfer function in split layout: [Hr | Hr] and [-Hi | Hi].
        self.hc = jnp.asarray(
            np.stack([np.concatenate([hr, hr], axis=1),
                      np.concatenate([-hi, hi], axis=1)]), jnp.float32)

    def __call__(self, x):
        """x: complex (n, n) or batched (B, n, n). Returns the propagated map
        at z_next (same shape as x)."""
        x = jnp.asarray(x, jnp.complex64)
        squeeze = x.ndim == 2
        xb = x[None] if squeeze else x
        if self.n_size <= _MAX_DFT_N:
            out = _propagate(xb, self.m_in, self.fl, self.hc, self.gl,
                             self.m_out)
        else:
            out = _propagate_fft(xb, self.h_complex)
        out = out[0] if squeeze else out
        self.output_map = out
        return out


if __name__ == "__main__":
    n_size = 64
    batch = 2
    key = jax.random.PRNGKey(0)
    k_layer, k_re, k_im = jax.random.split(key, 3)

    # Physical coordinates / constants (as in the module).
    x_coords = np.linspace(-1e-3, 1e-3, n_size)
    y_coords = np.linspace(-1e-3, 1e-3, n_size)
    layer = InputDiffractiveLayer(
        n_size=n_size,
        x_coordinates=x_coords,
        y_coordinates=y_coords,
        z_coordinate=0.0,
        z_next=1e-2,
        wavelength=652e-9,
        key=k_layer,
    )

    # Deterministic example input: a batch of complex amplitude maps.
    x_re = jax.random.normal(k_re, (batch, n_size, n_size), jnp.float32)
    x_im = jax.random.normal(k_im, (batch, n_size, n_size), jnp.float32)
    x = x_re + 1j * x_im

    out = layer(x)
    jax.block_until_ready(out)

    # Plain-JAX reference: full angular-spectrum propagation with the same H.
    H = layer.h_re + 1j * layer.h_im
    ref = jnp.fft.ifft2(jnp.fft.fft2(x) * H[None])
    # DFT-as-matmul (f32, HIGHEST precision) vs. XLA FFT rounding differs at
    # the ~1e-5 level for n=64; 5e-4 keeps a wide margin while still catching
    # any MXU-precision regression (single-pass bf16 would fail by >10x).
    np.testing.assert_allclose(np.asarray(out), np.asarray(ref),
                               rtol=5e-4, atol=5e-4)

    print("KERNEL_OK")
</pallas_src>

<mosaic_0001>
module attributes {stable_mosaic.version = 11 : i64} {
  func.func @_angular_spectrum_kernel(%arg0: i32, %arg1: memref<1x64x128xf32, #tpu.memory_space<vmem>>, %arg2: memref<128x128xf32, #tpu.memory_space<vmem>>, %arg3: memref<128x64xf32, #tpu.memory_space<vmem>>, %arg4: memref<2x64x128xf32, #tpu.memory_space<vmem>>, %arg5: memref<128x64xf32, #tpu.memory_space<vmem>>, %arg6: memref<128x128xf32, #tpu.memory_space<vmem>>, %arg7: memref<1x64x128xf32, #tpu.memory_space<vmem>>) attributes {dimension_semantics = [#tpu.dimension_semantics<parallel>], iteration_bounds = array<i64: 2>, scalar_prefetch = 0 : i64, scratch_operands = 0 : i64, tpu.core_type = #tpu.core_type<tc>, window_params = [{transform_indices = @transform_0, window_bounds = array<i64: 1, 64, 128>}, {pipeline_mode = #tpu.pipeline_mode<synchronous>, transform_indices = @transform_1, window_bounds = array<i64: 128, 128>}, {pipeline_mode = #tpu.pipeline_mode<synchronous>, transform_indices = @transform_2, window_bounds = array<i64: 128, 64>}, {pipeline_mode = #tpu.pipeline_mode<synchronous>, transform_indices = @transform_3, window_bounds = array<i64: 2, 64, 128>}, {pipeline_mode = #tpu.pipeline_mode<synchronous>, transform_indices = @transform_4, window_bounds = array<i64: 128, 64>}, {pipeline_mode = #tpu.pipeline_mode<synchronous>, transform_indices = @transform_5, window_bounds = array<i64: 128, 128>}, {transform_indices = @transform_6, window_bounds = array<i64: 1, 64, 128>}]} {
    %c0 = arith.constant 0 : index
    %c0_0 = arith.constant 0 : index
    %c0_1 = arith.constant 0 : index
    %0 = vector.load %arg1[%c0, %c0_0, %c0_1] : memref<1x64x128xf32, #tpu.memory_space<vmem>>, vector<1x64x128xf32>
    %1 = vector.shape_cast %0 : vector<1x64x128xf32> to vector<64x128xf32>
    %2 = tpu.iota {dimensions = array<i32: 1>} : vector<64x128xi32>
    %c64_i32 = arith.constant 64 : i32
    %3 = vector.broadcast %c64_i32 : i32 to vector<64x128xi32>
    %4 = arith.cmpi slt, %2, %3 : vector<64x128xi32>
    %cst = arith.constant -1.000000e+00 : f32
    %cst_2 = arith.constant 1.000000e+00 : f32
    %5 = vector.broadcast %cst : f32 to vector<64x128xf32>
    %6 = vector.broadcast %cst_2 : f32 to vector<64x128xf32>
    %7 = arith.select %4, %5, %6 : vector<64x128xi1>, vector<64x128xf32>
    %c0_3 = arith.constant 0 : index
    %c0_4 = arith.constant 0 : index
    %8 = vector.load %arg2[%c0_3, %c0_4] : memref<128x128xf32, #tpu.memory_space<vmem>>, vector<128x128xf32>
    %cst_5 = arith.constant dense<0.000000e+00> : vector<64x128xf32>
    %9 = tpu.matmul %1, %8, %cst_5 {dimension_numbers = #tpu.dot_dimension_numbers<[1], [0], [0], [1], [0, 0, 1, 1], [], []>, precision = #tpu.contract_precision<fp32>} : vector<64x128xf32>, vector<128x128xf32>, vector<64x128xf32> -> vector<64x128xf32>
    %c0_6 = arith.constant 0 : index
    %c0_7 = arith.constant 0 : index
    %10 = vector.load %arg3[%c0_6, %c0_7] : memref<128x64xf32, #tpu.memory_space<vmem>>, vector<128x64xf32>
    %cst_8 = arith.constant dense<0.000000e+00> : vector<128x128xf32>
    %11 = tpu.matmul %10, %9, %cst_8 {dimension_numbers = #tpu.dot_dimension_numbers<[1], [0], [0], [1], [0, 0, 1, 1], [], []>, precision = #tpu.contract_precision<fp32>} : vector<128x64xf32>, vector<64x128xf32>, vector<128x128xf32> -> vector<128x128xf32>
    %12 = vector.extract_strided_slice %11 {offsets = [0, 0], sizes = [64, 128], strides = [1, 1]} : vector<128x128xf32> to vector<64x128xf32>
    %13 = vector.extract_strided_slice %11 {offsets = [64, 0], sizes = [64, 128], strides = [1, 1]} : vector<128x128xf32> to vector<64x128xf32>
    %c64_i32_9 = arith.constant 64 : i32
    %14 = tpu.dynamic_rotate %13 by %c64_i32_9 dim 1 : vector<64x128xf32>, i32 -> vector<64x128xf32>
    %15 = arith.mulf %14, %7 : vector<64x128xf32>
    %16 = arith.addf %12, %15 : vector<64x128xf32>
    %c0_10 = arith.constant 0 : index
    %c0_11 = arith.constant 0 : index
    %c0_12 = arith.constant 0 : index
    %17 = vector.load %arg4[%c0_10, %c0_11, %c0_12] : memref<2x64x128xf32, #tpu.memory_space<vmem>>, vector<1x64x128xf32>
    %18 = vector.shape_cast %17 : vector<1x64x128xf32> to vector<64x128xf32>
    %19 = arith.mulf %18, %16 : vector<64x128xf32>
    %c1 = arith.constant 1 : index
    %c0_13 = arith.constant 0 : index
    %c0_14 = arith.constant 0 : index
    %20 = vector.load %arg4[%c1, %c0_13, %c0_14] : memref<2x64x128xf32, #tpu.memory_space<vmem>>, vector<1x64x128xf32>
    %21 = vector.shape_cast %20 : vector<1x64x128xf32> to vector<64x128xf32>
    %c64_i32_15 = arith.constant 64 : i32
    %22 = tpu.dynamic_rotate %16 by %c64_i32_15 dim 1 : vector<64x128xf32>, i32 -> vector<64x128xf32>
    %23 = arith.mulf %21, %22 : vector<64x128xf32>
    %24 = arith.addf %19, %23 : vector<64x128xf32>
    %c0_16 = arith.constant 0 : index
    %c0_17 = arith.constant 0 : index
    %25 = vector.load %arg5[%c0_16, %c0_17] : memref<128x64xf32, #tpu.memory_space<vmem>>, vector<128x64xf32>
    %cst_18 = arith.constant dense<0.000000e+00> : vector<128x128xf32>
    %26 = tpu.matmul %25, %24, %cst_18 {dimension_numbers = #tpu.dot_dimension_numbers<[1], [0], [0], [1], [0, 0, 1, 1], [], []>, precision = #tpu.contract_precision<fp32>} : vector<128x64xf32>, vector<64x128xf32>, vector<128x128xf32> -> vector<128x128xf32>
    %27 = vector.extract_strided_slice %26 {offsets = [0, 0], sizes = [64, 128], strides = [1, 1]} : vector<128x128xf32> to vector<64x128xf32>
    %28 = vector.extract_strided_slice %26 {offsets = [64, 0], sizes = [64, 128], strides = [1, 1]} : vector<128x128xf32> to vector<64x128xf32>
    %c64_i32_19 = arith.constant 64 : i32
    %29 = tpu.dynamic_rotate %28 by %c64_i32_19 dim 1 : vector<64x128xf32>, i32 -> vector<64x128xf32>
    %30 = arith.mulf %29, %7 : vector<64x128xf32>
    %31 = arith.addf %27, %30 : vector<64x128xf32>
    %c0_20 = arith.constant 0 : index
    %c0_21 = arith.constant 0 : index
    %32 = vector.load %arg6[%c0_20, %c0_21] : memref<128x128xf32, #tpu.memory_space<vmem>>, vector<128x128xf32>
    %cst_22 = arith.constant dense<0.000000e+00> : vector<64x128xf32>
    %33 = tpu.matmul %31, %32, %cst_22 {dimension_numbers = #tpu.dot_dimension_numbers<[1], [0], [0], [1], [0, 0, 1, 1], [], []>, precision = #tpu.contract_precision<fp32>} : vector<64x128xf32>, vector<128x128xf32>, vector<64x128xf32> -> vector<64x128xf32>
    %c0_23 = arith.constant 0 : index
    %c0_24 = arith.constant 0 : index
    %c0_25 = arith.constant 0 : index
    %34 = vector.load %arg7[%c0_23, %c0_24, %c0_25] : memref<1x64x128xf32, #tpu.memory_space<vmem>>, vector<1x64x128xf32>
    %35 = vector.shape_cast %34 : vector<1x64x128xf32> to vector<64x128xf32>
    %36 = vector.shape_cast %33 : vector<64x128xf32> to vector<1x64x128xf32>
    tpu.vector_store %arg7[%c0_23, %c0_24, %c0_25], %36 {strides = array<i32>} : memref<1x64x128xf32, #tpu.memory_space<vmem>>, vector<1x64x128xf32>,
    return
  }
  func.func @transform_0(%arg0: i32) -> (i32, i32, i32) {
    %c0_i32 = arith.constant 0 : i32
    %c0_i32_0 = arith.constant 0 : i32
    %c0_i32_1 = arith.constant 0 : i32
    return %arg0, %c0_i32, %c0_i32_0 : i32, i32, i32
  }
  func.func @transform_1(%arg0: i32) -> (i32, i32) {
    %c0_i32 = arith.constant 0 : i32
    %c0_i32_0 = arith.constant 0 : i32
    %c0_i32_1 = arith.constant 0 : i32
    return %c0_i32, %c0_i32_0 : i32, i32
  }
  func.func @transform_2(%arg0: i32) -> (i32, i32) {
    %c0_i32 = arith.constant 0 : i32
    %c0_i32_0 = arith.constant 0 : i32
    %c0_i32_1 = arith.constant 0 : i32
    return %c0_i32, %c0_i32_0 : i32, i32
  }
  func.func @transform_3(%arg0: i32) -> (i32, i32, i32) {
    %c0_i32 = arith.constant 0 : i32
    %c0_i32_0 = arith.constant 0 : i32
    %c0_i32_1 = arith.constant 0 : i32
    %c0_i32_2 = arith.constant 0 : i32
    return %c0_i32, %c0_i32_0, %c0_i32_1 : i32, i32, i32
  }
  func.func @transform_4(%arg0: i32) -> (i32, i32) {
    %c0_i32 = arith.constant 0 : i32
    %c0_i32_0 = arith.constant 0 : i32
    %c0_i32_1 = arith.constant 0 : i32
    return %c0_i32, %c0_i32_0 : i32, i32
  }
  func.func @transform_5(%arg0: i32) -> (i32, i32) {
    %c0_i32 = arith.constant 0 : i32
    %c0_i32_0 = arith.constant 0 : i32
    %c0_i32_1 = arith.constant 0 : i32
    return %c0_i32, %c0_i32_0 : i32, i32
  }
  func.func @transform_6(%arg0: i32) -> (i32, i32, i32) {
    %c0_i32 = arith.constant 0 : i32
    %c0_i32_0 = arith.constant 0 : i32
    %c0_i32_1 = arith.constant 0 : i32
    return %arg0, %c0_i32, %c0_i32_0 : i32, i32, i32
  }
}

</mosaic_0001>

<bundles_post_ra>
// kernel: custom-call.1
= control target key start
LH: loop header
LB: loop body
LE: loop exit
PB: predicated region body
PF: predicated region fallthrough
CT: control target
= control target key end

     0   :  { %s59_s0 = inlined_call_operand.hbm [shape: c64[2,64,64], index: 0, kind: input, shape index: {}]   ;;  %s60_s1 = inlined_call_operand.vmem [shape: f32[2,64,64], index: 1, kind: output, shape index: {}]  }
   0x1   :  { %s2_s8 = scalar_lea.hbm %s59_s0, 2048 }
   0x2   :  { %3 = vsyncpa [#allocation0], 0  ;;  %s4_s11 = sshll.u32 %s60_s1, 4  ;;  %s34_s14 = scalar_lea.hbm %s59_s0, 4096  ;;  %s5_s11 = int_to_ptr.vmem [resolvable:$true] %s4_s11 }
   0x3   :  { %p11_p0 = scmp.ne.s32.totalorder %s2_s8, %s34_s14  ;;  %p13_p1 = scmp.lt.u32.totalorder %s2_s8, %s59_s0 }
   0x4   :  { %p14_p2 = scmp.lt.u32.totalorder %s34_s14, %s34_s14  ;;  %p16_p4 = scmp.lt.u32.totalorder %s34_s14, %s2_s8 }
   0x6   :  { %p15_p3 = por %p14_p2, %p13_p1 }
   0x8   :  { %p17_p5 = por %p16_p4, %p15_p3 }
   0xa   :  { %p18_p6 = pnand %p17_p5, %p11_p0 }
   0xc   :  { %21 = shalt.err (!%p18_p6)  }
   0xd   :  { %s22_s17 = scalar_lea.vmem %s5_s11, 2048  ;;  %p27_p8 = scmp.lt.s32.totalorder %s5_s11, %s5_s11 }
   0xe   :  { %p23_p7 = scmp.ne.s32.totalorder %s5_s11, %s22_s17  ;;  %p28_p9 = scmp.lt.s32.totalorder %s22_s17, %s22_s17 }
  0x10   :  { %p29_p10 = por %p28_p9, %p27_p8 }
  0x12   :  { %p30_p11 = pnand %p29_p10, %p23_p7 }
  0x14   :  { %33 = shalt.err (!%p30_p11)  }
  0x15   :  { %7 = dma.hbm_to_vmem [thread:$0]  %s2_s8, 2048, %s5_s11, [#allocation0] }
  0x16   :  { %35 = dma.done.wait [#allocation0], 2048  }
  0x17   :  { %36 = vsyncadd [#allocation0], 4294965248 }
  0x18   :  { %9 = vsyncpa [#allocation0], 1 }

// kernel: custom-call
= control target key start
LH: loop header
LB: loop body
LE: loop exit
PB: predicated region body
PF: predicated region fallthrough
CT: control target
= control target key end

     0   :  { %2 = vsyncpa [#allocation0], 0  ;;  %s61_s0 = inlined_call_operand.hbm [shape: c64[2,64,64], index: 0, kind: input, shape index: {}]   ;;  %s62_s1 = inlined_call_operand.vmem [shape: f32[2,64,64], index: 1, kind: output, shape index: {}]  }
   0x1   :  { %s3_s8 = sshll.u32 %s62_s1, 4  ;;  %s9_s11 = scalar_lea.hbm %s61_s0, 2048  ;;  %s4_s8 = int_to_ptr.vmem [resolvable:$true] %s3_s8 }
   0x2   :  { %p10_p0 = scmp.ne.s32.totalorder %s61_s0, %s9_s11  ;;  %s11_s16 = scalar_lea.hbm %s61_s0, 4096 }
   0x3   :  { %p12_p1 = scmp.lt.u32.totalorder %s11_s16, %s9_s11  ;;  %p13_p2 = scmp.lt.u32.totalorder %s9_s11, %s61_s0 }
   0x5   :  { %p14_p3 = por %p13_p2, %p12_p1 }
   0x7   :  { %p15_p4 = pnand %p14_p3, %p10_p0 }
   0x9   :  { %18 = shalt.err (!%p15_p4)  }
   0xa   :  { %s19_s1 = scalar_lea.vmem %s4_s8, 2048  ;;  %p24_p6 = scmp.lt.s32.totalorder %s4_s8, %s4_s8 }
   0xb   :  { %p20_p5 = scmp.ne.s32.totalorder %s4_s8, %s19_s1  ;;  %p25_p7 = scmp.lt.s32.totalorder %s19_s1, %s19_s1 }
   0xd   :  { %p26_p8 = por %p25_p7, %p24_p6 }
   0xf   :  { %p27_p9 = pnand %p26_p8, %p20_p5 }
  0x11   :  { %30 = shalt.err (!%p27_p9)  }
  0x12   :  { %6 = dma.hbm_to_vmem [thread:$0]  %s61_s0, 2048, %s4_s8, [#allocation0] }
  0x13   :  { %31 = dma.done.wait [#allocation0], 2048  }
  0x14   :  { %32 = vsyncadd [#allocation0], 4294965248 }
  0x15   :  { %8 = vsyncpa [#allocation0], 1 }

// kernel: custom-call.2
= control target key start
LH: loop header
LB: loop body
LE: loop exit
PB: predicated region body
PF: predicated region fallthrough
CT: control target
= control target key end

     0   :  { %s126_s0 = inlined_call_operand.vmem [shape: f32[2,64,64], index: 0, kind: input, shape index: {}]   ;;  %s127_s1 = inlined_call_operand.vmem [shape: f32[2,64,64], index: 1, kind: input, shape index: {}]   ;;  %s128_s2 = inlined_call_operand.hbm [shape: c64[2,64,64], index: 2, kind: output, shape index: {}]  }
   0x1   :  { %s87_s11 = scalar_lea.hbm %s128_s2, 2048 }
   0x2   :  { %4 = vsyncpa [#allocation0], 0  ;;  %s5_s14 = sshll.u32 %s126_s0, 4  ;;  %s6_s14 = int_to_ptr.vmem [resolvable:$true] %s5_s14 }
   0x3   :  { %s18_s15 = scalar_lea.vmem %s6_s14, 2048  ;;  %p23_p1 = scmp.lt.s32.totalorder %s6_s14, %s6_s14 }
   0x4   :  { %p19_p0 = scmp.ne.s32.totalorder %s6_s14, %s18_s15  ;;  %p24_p2 = scmp.lt.s32.totalorder %s18_s15, %s18_s15 }
   0x6   :  { %p25_p3 = por %p24_p2, %p23_p1 }
   0x8   :  { %p26_p4 = pnand %p25_p3, %p19_p0 }
   0xa   :  { %29 = shalt.err (!%p26_p4)  }
   0xb   :  { %p31_p5 = scmp.ne.s32.totalorder %s128_s2, %s87_s11  ;;  %s32_s0 = scalar_lea.hbm %s128_s2, 4096 }
   0xc   :  { %p33_p6 = scmp.lt.u32.totalorder %s32_s0, %s87_s11  ;;  %p34_p7 = scmp.lt.u32.totalorder %s87_s11, %s128_s2 }
   0xe   :  { %p35_p8 = por %p34_p7, %p33_p6 }
  0x10   :  { %p36_p9 = pnand %p35_p8, %p31_p5 }
  0x12   :  { %39 = shalt.err (!%p36_p9)  }
  0x13   :  { %8 = dma.vmem_to_hbm [thread:$0]  %s6_s14, 2048, %s128_s2, [#allocation0] }
  0x14   :  { %65 = dma.done.wait [#allocation0], 2048  }
  0x15   :  { %66 = vsyncadd [#allocation0], 4294965248 }
  0x16   :  { %10 = vsyncpa [#allocation0], 1 }
  0x17   :  { %11 = vsyncpa [#allocation1], 0  ;;  %s12_s28 = sshll.u32 %s127_s1, 4  ;;  %s13_s28 = int_to_ptr.vmem [resolvable:$true] %s12_s28 }
  0x18   :  { %s40_s29 = scalar_lea.vmem %s13_s28, 2048  ;;  %p45_p11 = scmp.lt.s32.totalorder %s13_s28, %s13_s28 }
  0x19   :  { %p41_p10 = scmp.ne.s32.totalorder %s13_s28, %s40_s29  ;;  %p46_p12 = scmp.lt.s32.totalorder %s40_s29, %s40_s29 }
  0x1b   :  { %p47_p13 = por %p46_p12, %p45_p11 }
  0x1d   :  { %p48_p0 = pnand %p47_p13, %p41_p10 }
  0x1f   :  { %51 = shalt.err (!%p48_p0)  }
  0x20   :  { %p53_p1 = scmp.ne.s32.totalorder %s87_s11, %s32_s0  ;;  %p56_p2 = scmp.lt.u32.totalorder %s32_s0, %s32_s0 }
  0x22   :  { %p57_p3 = por %p56_p2, %p34_p7 }
  0x24   :  { %p59_p4 = por %p57_p3, %p33_p6 }
  0x26   :  { %p60_p5 = pnand %p59_p4, %p53_p1 }
  0x28   :  { %63 = shalt.err (!%p60_p5)  }
  0x29   :  { %15 = dma.vmem_to_hbm [thread:$0]  %s13_s28, 2048, %s87_s11, [#allocation1] }
  0x2a   :  { %67 = dma.done.wait [#allocation1], 2048  }
  0x2b   :  { %68 = vsyncadd [#allocation1], 4294965248 }
  0x2c   :  { %17 = vsyncpa [#allocation1], 1 }

// kernel: _propagate.1
= control target key start
LH: loop header
LB: loop body
LE: loop exit
PB: predicated region body
PF: predicated region fallthrough
CT: control target
= control target key end

     0   :  { %s7333_s21 = smov 0   ;;  %s9200_s0 = inlined_call_operand.vmem [shape: f32[2,64,128], index: 0, kind: input, shape index: {}, may-alias: {0,6}]   ;;  %s9201_s1 = inlined_call_operand.vmem [shape: f32[128,128], index: 1, kind: input, shape index: {}]   ;;  %s9202_s2 = inlined_call_operand.vmem [shape: f32[128,64], index: 2, kind: input, shape index: {}]   ;;  %s9203_s3 = inlined_call_operand.vmem [shape: f32[2,64,128], index: 3, kind: input, shape index: {}]   ;;  %s9204_s4 = inlined_call_operand.vmem [shape: f32[128,64], index: 4, kind: input, shape index: {}]   ;;  %s9205_s5 = inlined_call_operand.vmem [shape: f32[128,128], index: 5, kind: input, shape index: {}]   ;;  %s9206_s6 = inlined_call_operand.vmem [shape: f32[2,64,128], index: 6, kind: output, shape index: {}, may-alias: {0,6}]  }
   0x1 LB: > { %s4857_s22 = sadd.s32 4294967295, %s7294_s21   ;;  %p4861_p0 = scmp.ge.s32.totalorder %s7294_s21, 1  ;;  %s7294_s21 = sphi %s7333_s21, %s16_s21  }
   0x2   : > { %p212_p1 = scmp.lt.s32.totalorder %s7294_s21, 3 }
   0x4   : > { %p213_p2 = pnand %p4861_p0, %p212_p1 }
   0x6   : > { %216 = sbr.rel (%p213_p2) target bundleno = 1999 (0x7cf), region = 44 }
   0xd   : > { %v264_v0 = vld [vmem:[%s9201_s1] sm:$0xff]  ;;  %v265_v1 = vld [vmem:[%s9201_s1 + $0x8] sm:$0xff]  ;;  %v266_v2 = vld [vmem:[%s9201_s1 + $0x10] sm:$0xff]  ;;  %p7350_p3 = scmp.lt.s32.totalorder %s4857_s22, 1  ;;  %vm1238_vm0 = vcmask 523264   ;;  %s7296_s28 = smov 64  }
   0xe   : > { %v281_v3 = vand.u32 4294901760, %v264_v0  ;;  %v284_v4 = vand.u32 4294901760, %v265_v1  ;;  %v267_v5 = vld [vmem:[%s9201_s1 + $0x18] sm:$0xff]  ;;  %v287_v6 = vand.u32 4294901760, %v266_v2  ;;  %v268_v7 = vld [vmem:[%s9201_s1 + $0x20] sm:$0xff]  ;;  %v269_v8 = vld [vmem:[%s9201_s1 + $0x28] sm:$0xff] }
   0xf   : > { %v290_v9 = vand.u32 4294901760, %v267_v5  ;;  %v293_v11 = vand.u32 4294901760, %v268_v7  ;;  %v296_v12 = vand.u32 4294901760, %v269_v8  ;;  %v7370_v14 = vld [vmem:[%s9201_s1 + $0x30] sm:$0xff]  ;;  %v7375_v15 = vld [vmem:[%s9201_s1 + $0x38] sm:$0xff]  ;;  %s9350_s22 = smov (!%p7350_p3, %s4857_s22), 1 }
  0x10   : > { %v7363_v10 = vpack.c.bf16 %v284_v4, %v281_v3  ;;  %s4876_s16 = sshll.u32 %s9350_s22, 6  ;;  %v299_v17 = vand.u32 4294901760, %v7370_v14  ;;  %v302_v18 = vand.u32 4294901760, %v7375_v15  ;;  %v7392_v19 = vld [vmem:[%s9201_s1 + $0x40] sm:$0xff]  ;;  %v7397_v20 = vld [vmem:[%s9201_s1 + $0x48] sm:$0xff]  ;;  %v7413_v26 = vsub.f32 %v264_v0, %v281_v3  ;;  %v7425_v29 = vld [vmem:[%s9201_s1 + $0x50] sm:$0xff] }
  0x11   : > { %v7365_v13 = vpack.c.bf16 %v290_v9, %v287_v6  ;;  %v7385_v16 = vpack.c.bf16 %v296_v12, %v293_v11  ;;  %s7404_s25 = scalar_lea.vmem %s9200_s0, %s4876_s16  ;;  %v305_v24 = vand.u32 4294901760, %v7392_v19  ;;  %v308_v25 = vand.u32 4294901760, %v7397_v20  ;;  %v7430_v30 = vld [vmem:[%s9201_s1 + $0x58] sm:$0xff]  ;;  %v7461_v43 = vld [vmem:[%s9201_s1 + $0x60] sm:$0xff]  ;;  %v7472_v48 = vld [vmem:[%s9201_s1 + $0x68] sm:$0xff] }
  0x12   : > { %6463 = vmatprep.subr.bf16.mxu0 %v7363_v10  ;;  %v252_v21 = vld [vmem:[%s7404_s25] sm:$0xff]  ;;  %v253_v23 = vld [vmem:[%s7404_s25 + $0x8] sm:$0xff]  ;;  %v7415_v27 = vsub.f32 %v265_v1, %v284_v4  ;;  %v7420_v28 = vpack.c.bf16 %v302_v18, %v299_v17  ;;  %v7435_v32 = vsub.f32 %v266_v2, %v287_v6  ;;  %v7437_v33 = vsub.f32 %v267_v5, %v290_v9  ;;  %v254_v47 = vld [vmem:[%s7404_s25 + $0x10] sm:$0xff] }
  0x13   : > { %6465 = vmatpush3.bf16.msra.mxu0 %v7363_v10  ;;  %9274 = vst [vmem:[#allocation2_spill] sm:$0xff] %v7385_v16  ;;  %v7407_v22 = vand.u32 4294901760, %v252_v21  ;;  %v7439_v34 = vand.u32 4294901760, %v253_v23  ;;  %v7441_v35 = vsub.f32 %v268_v7, %v293_v11  ;;  %v7443_v36 = vsub.f32 %v269_v8, %v296_v12  ;;  %v255_v53 = vld [vmem:[%s7404_s25 + $0x18] sm:$0xff]  ;;  %v7485_v55 = vld [vmem:[%s9201_s1 + $0x70] sm:$0xff]  ;;  %v256_v0 = vld [vmem:[%s7404_s25 + $0x20] sm:$0xff] }
  0x14   : > { %6467 = vmatprep.subr.bf16.mxu0 %v7365_v13  ;;  %9275 = vst [vmem:[#allocation3_spill] sm:$0xff] %v7420_v28  ;;  %v311_v38 = vand.u32 4294901760, %v7425_v29  ;;  %v314_v39 = vand.u32 4294901760, %v7430_v30  ;;  %v9216_v40 = vand.u32 4294901760, %v7413_v26  ;;  %v9214_v41 = vand.u32 4294901760, %v7415_v27  ;;  %v7490_v56 = vld [vmem:[%s9201_s1 + $0x78] sm:$0xff] }
  0x15   : > { %v7433_v31 = vsub.f32 %v252_v21, %v7407_v22  ;;  %v7456_v42 = vpack.c.bf16 %v308_v25, %v305_v24  ;;  %v9212_v45 = vand.u32 4294901760, %v7435_v32  ;;  %v9211_v46 = vand.u32 4294901760, %v7437_v33 }
  0x16   : > { %v7475_v49 = vsub.f32 %v253_v23, %v7439_v34  ;;  %v9210_v50 = vand.u32 4294901760, %v7441_v35  ;;  %v9209_v51 = vand.u32 4294901760, %v7443_v36  ;;  %v317_v54 = vand.u32 4294901760, %v7461_v43 }
  0x17   : > { %6469 = vmatpush3.bf16.msra.mxu0 %v7365_v13  ;;  %v9207_v37 = vand.u32 4294901760, %v7433_v31  ;;  %9276 = vst [vmem:[#allocation4_spill] sm:$0xff] %v7456_v42  ;;  %v445_v57 = vsub.f32 %v7413_v26, %v9216_v40  ;;  %v452_v58 = vsub.f32 %v7415_v27, %v9214_v41  ;;  %v7498_v59 = vand.u32 4294901760, %v254_v47 }
  0x18   : > { %6471 = vmatprep.subr.bf16.mxu0 %v7385_v16  ;;  %v7505_v60 = vpack.c.bf16 %v314_v39, %v311_v38  ;;  %v320_v61 = vand.u32 4294901760, %v7472_v48  ;;  %v459_v62 = vsub.f32 %v7435_v32, %v9212_v45  ;;  %v466_v63 = vsub.f32 %v7437_v33, %v9211_v46 }
  0x19   : > { %v364_v44 = vsub.f32 %v7433_v31, %v9207_v37  ;;  %v9208_v1 = vand.u32 4294901760, %v7475_v49  ;;  %v473_v2 = vsub.f32 %v7441_v35, %v9210_v50  ;;  %v480_v3 = vsub.f32 %v7443_v36, %v9209_v51  ;;  %v258_v37 = vld [vmem:[%s7404_s25 + $0x30] sm:$0xff] }
  0x1a   : > { %9277 = vst [vmem:[#allocation5_spill] sm:$0xff] %v7505_v60  ;;  %v7522_v4 = vand.u32 4294901760, %v255_v53  ;;  %v323_v5 = vand.u32 4294901760, %v7485_v55  ;;  %v326_v6 = vand.u32 4294901760, %v7490_v56  ;;  %v7527_v7 = vsub.f32 %v7370_v14, %v299_v17 }
  0x1b   : > { %6473 = vmatpush3.bf16.msra.mxu0 %v7385_v16  ;;  %v365_v52 = vand.u32 4294901760, %v364_v44  ;;  %v446_v8 = vand.u32 4294901760, %v445_v57  ;;  %v453_v9 = vand.u32 4294901760, %v452_v58  ;;  %v7531_v11 = vsub.f32 %v254_v47, %v7498_v59  ;;  %v257_v58 = vld [vmem:[%s7404_s25 + $0x28] sm:$0xff] }
  0x1c   : > { %6475 = vmatprep.subr.bf16.mxu0 %v7420_v28  ;;  %v7533_v12 = vand.u32 4294901760, %v256_v0  ;;  %v7538_v21 = vpack.c.bf16 %v320_v61, %v317_v54  ;;  %v460_v23 = vand.u32 4294901760, %v459_v62  ;;  %v467_v44 = vand.u32 4294901760, %v466_v63 }
  0x1d   : > { %5486 = vmatprep.mubr.f32.mxu0 %v365_v52  ;;  %v7541_v14 = vsub.f32 %v255_v53, %v7522_v4  ;;  %v374_v17 = vsub.f32 %v7475_v49, %v9208_v1  ;;  %v474_v52 = vand.u32 4294901760, %v473_v2  ;;  %v481_v47 = vand.u32 4294901760, %v480_v3 }
  0x1e   : > { %9278 = vst [vmem:[#allocation6_spill] sm:$0xff] %v7538_v21  ;;  %v7549_v57 = vsub.f32 %v7375_v15, %v302_v18  ;;  %v486_v62 = vand.u32 4294901760, %v7527_v7  ;;  %v7557_v53 = vsub.f32 %v7392_v19, %v305_v24  ;;  %v7560_v63 = vpack.c.bf16 %v326_v6, %v323_v5  ;;  %v259_v24 = vld [vmem:[%s7404_s25 + $0x38] sm:$0xff]  ;;  %s251_s25 = scalar_lea.vmem %s9206_s6, %s4876_s16 }
  0x1f   : > { %6477 = vmatpush3.bf16.msra.mxu0 %v7420_v28  ;;  %v6494_v2 = vpack.c.bf16 %v453_v9, %v446_v8  ;;  %v9213_v3 = vand.u32 4294901760, %v7531_v11  ;;  %v7564_v1 = vsub.f32 %v256_v0, %v7533_v12  ;;  %v7567_v15 = vpack.c.bf16 %v467_v44, %v460_v23 }
  0x20   : > { %6479 = vmatprep.subr.bf16.mxu0 %v7456_v42  ;;  %9279 = vst [vmem:[#allocation7_spill] sm:$0xff] %v7560_v63  ;;  %v9215_v18 = vand.u32 4294901760, %v7541_v14  ;;  %v7570_v51 = vand.u32 4294901760, %v257_v58  ;;  %v7572_v19 = vand.u32 4294901760, %v258_v37  ;;  %v375_v50 = vand.u32 4294901760, %v374_v17 }
  0x21   : > { %9280 = vst [vmem:[#allocation8_spill] sm:$0xff] %v7564_v1  ;;  %v7575_v46 = vpack.c.bf16 %v481_v47, %v474_v52  ;;  %v493_v8 = vand.u32 4294901760, %v7549_v57  ;;  %v7581_v0 = vsub.f32 %v7397_v20, %v308_v25  ;;  %v487_v9 = vsub.f32 %v7527_v7, %v486_v62 }
  0x22   : > { %v500_v23 = vand.u32 4294901760, %v7557_v53  ;;  %v7586_v44 = vsub.f32 %v257_v58, %v7570_v51  ;;  %v7589_v45 = vsub.f32 %v258_v37, %v7572_v19  ;;  %v384_v17 = vsub.f32 %v7531_v11, %v9213_v3 }
  0x23   : > { %6481 = vmatpush3.bf16.msra.mxu0 %v7456_v42  ;;  %v7598_v20 = vsub.f32 %v7425_v29, %v311_v38  ;;  %v9219_v25 = vand.u32 4294901760, %v7564_v1  ;;  %v7601_v52 = vand.u32 4294901760, %v259_v24  ;;  %v7607_v37 = vsub.f32 %v7430_v30, %v314_v39 }
  0x24   : > { %6483 = vmatprep.subr.bf16.mxu0 %v7505_v60  ;;  %9281 = vst [vmem:[#allocation9_spill] sm:$0xff] %v7586_v44  ;;  %9282 = vst [vmem:[#allocation10_spill] sm:$0xff] %v7589_v45  ;;  %v394_v47 = vsub.f32 %v7541_v14, %v9215_v18  ;;  %v7615_v29 = vsub.f32 %v7461_v43, %v317_v54  ;;  %v7618_v38 = vsub.f32 %v7472_v48, %v320_v61 }
  0x25   : > { %v9228_v58 = vand.u32 4294901760, %v7586_v44  ;;  %v9231_v3 = vand.u32 4294901760, %v7589_v45  ;;  %v7623_v41 = vsub.f32 %v7485_v55, %v323_v5  ;;  %v7626_v30 = vsub.f32 %v7490_v56, %v326_v6 }
  0x26   : > { %v488_v39 = vand.u32 4294901760, %v487_v9  ;;  %v494_v18 = vsub.f32 %v7549_v57, %v493_v8  ;;  %v507_v40 = vand.u32 4294901760, %v7581_v0  ;;  %v7631_v43 = vsub.f32 %v259_v24, %v7601_v52 }
  0x27   : > { %6485 = vmatpush3.bf16.msra.mxu0 %v7505_v60  ;;  %v501_v48 = vsub.f32 %v7557_v53, %v500_v23  ;;  %v385_v54 = vand.u32 4294901760, %v384_v17  ;;  %v514_v61 = vand.u32 4294901760, %v7598_v20  ;;  %v404_v55 = vsub.f32 %v7564_v1, %v9219_v25 }
  0x28   : > { %6487 = vmatprep.subr.bf16.mxu0 %v7538_v21  ;;  %v521_v56 = vand.u32 4294901760, %v7607_v37  ;;  %v395_v5 = vand.u32 4294901760, %v394_v47  ;;  %v528_v6 = vand.u32 4294901760, %v7615_v29  ;;  %v535_v24 = vand.u32 4294901760, %v7618_v38 }
  0x29   : > { %v414_v9 = vsub.f32 %v7586_v44, %v9228_v58  ;;  %v424_v17 = vsub.f32 %v7589_v45, %v9231_v3  ;;  %v549_v25 = vand.u32 4294901760, %v7626_v30  ;;  %v9283_v47 = vand.u32 4294901760, %v7413_v26 }
  0x2a   : > { %v9284_v60 = vand.u32 4294901760, %v7415_v27  ;;  %v9285_v28 = vand.u32 4294901760, %v7435_v32  ;;  %v9286_v58 = vand.u32 4294901760, %v7437_v33  ;;  %v9288_v3 = vand.u32 4294901760, %v7441_v35 }
  0x2b   : > { %6489 = vmatpush3.bf16.msra.mxu0 %v7538_v21  ;;  %v9289_v45 = vand.u32 4294901760, %v7443_v36  ;;  %v7669_v21 = vpack.c.bf16 %v493_v8, %v486_v62  ;;  %v7671_v1 = vpack.c.bf16 %v507_v40, %v500_v23  ;;  %v522_v8 = vsub.f32 %v7607_v37, %v521_v56 }
  0x2c   : > { %6491 = vmatprep.subr.bf16.mxu0 %v7560_v63  ;;  %v7655_v42 = vpack.c.bf16 %v9284_v60, %v9283_v47  ;;  %v7661_v44 = vpack.c.bf16 %v9286_v58, %v9285_v28  ;;  %v7673_v60 = vpack.c.bf16 %v521_v56, %v514_v61  ;;  %v495_v47 = vand.u32 4294901760, %v494_v18 }
  0x2d   : > { %v7667_v16 = vpack.c.bf16 %v9289_v45, %v9288_v3  ;;  %v508_v28 = vsub.f32 %v7581_v0, %v507_v40  ;;  %v7677_v58 = vpack.c.bf16 %v535_v24, %v528_v6  ;;  %v415_v45 = vand.u32 4294901760, %v414_v9 }
  0x2e   : > { %9287 = vst [vmem:[#allocation11_spill] sm:$0xff] %v7661_v44  ;;  %v515_v3 = vsub.f32 %v7598_v20, %v514_v61  ;;  %v425_v18 = vand.u32 4294901760, %v424_v17  ;;  %v6506_v40 = vpack.c.bf16 %v495_v47, %v488_v39  ;;  %v502_v23 = vand.u32 4294901760, %v501_v48 }
  0x2f   : > { %6493 = vmatpush3.bf16.msra.mxu0 %v7560_v63  ;;  %v542_v63 = vand.u32 4294901760, %v7623_v41  ;;  %v523_v9 = vand.u32 4294901760, %v522_v8  ;;  %v529_v61 = vsub.f32 %v7615_v29, %v528_v6  ;;  %v536_v56 = vsub.f32 %v7618_v38, %v535_v24 }
  0x30   : > { %6495 = vmatprep.subr.bf16.mxu0 %v6494_v2  ;;  %v6526_v24 = vpack.c.bf16 %v7415_v27, %v7413_v26  ;;  %v6538_v26 = vpack.c.bf16 %v7549_v57, %v7527_v7  ;;  %v6542_v27 = vpack.c.bf16 %v7581_v0, %v7557_v53  ;;  %v9293_v7 = vld [vmem:[#allocation9_spill] sm:$0xff]  ;;  %v9294_v57 = vld [vmem:[#allocation10_spill] sm:$0xff]  ;;  %v9295_v53 = vld [vmem:[#allocation3_spill] sm:$0xff]  ;;  %v9296_v0 = vand.u32 4294901760, %v7433_v31 }
  0x31   : > { %v7679_v44 = vpack.c.bf16 %v549_v25, %v542_v63  ;;  %v530_v39 = vand.u32 4294901760, %v529_v61  ;;  %v537_v48 = vand.u32 4294901760, %v536_v56  ;;  %v1228_v61 = vld [vmem:[%s9202_s2 + $0x30] sm:$0xff] }
  0x32   : > { %5487 = vmatmul.mubr.f32.vlgmr.msra.gmra.mrb[0].mxu0 %v375_v50  ;;  %v405_v50 = vand.u32 4294901760, %v404_v55 }
  0x33   : > { %6497 = vmatpush3.bf16.msra.mxu0 %v6494_v2  ;;  %5489 = vmatprep.mubr.f32.mxu0 %v385_v54  ;;  %v9290_v2 = vand.u32 4294901760, %v7631_v43  ;;  %v509_v54 = vand.u32 4294901760, %v508_v28  ;;  %v6518_v47 = vpack.c.bf16 %v537_v48, %v530_v39  ;;  %v1229_v39 = vld [vmem:[%s9202_s2 + $0x38] sm:$0xff] }
  0x34   : > { %6499 = vmatprep.subr.bf16.mxu0 %v7567_v15 }
  0x35   : > { %v434_v62 = vsub.f32 %v7631_v43, %v9290_v2  ;;  %v9303_v2 = vld [vmem:[#allocation11_spill] sm:$0xff] }
  0x36   : > { %5490 = vmatmul.mubr.f32.gmra.mrb[2].mxu0 %v395_v5  ;;  %v516_v5 = vand.u32 4294901760, %v515_v3 }
  0x37   : > { %6501 = vmatpush3.bf16.msra.mxu0 %v7567_v15  ;;  %5492 = vmatprep.mubr.f32.mxu0 %v405_v50  ;;  %v435_v55 = vand.u32 4294901760, %v434_v62  ;;  %v6510_v15 = vpack.c.bf16 %v509_v54, %v502_v23  ;;  %v543_v50 = vsub.f32 %v7623_v41, %v542_v63  ;;  %v6530_v63 = vpack.c.bf16 %v7437_v33, %v7435_v32 }
  0x38   : > { %6503 = vmatprep.subr.bf16.mxu0 %v7575_v46  ;;  %v6514_v17 = vpack.c.bf16 %v523_v9, %v516_v5  ;;  %v6546_v32 = vpack.c.bf16 %v7607_v37, %v7598_v20  ;;  %v6550_v33 = vpack.c.bf16 %v7618_v38, %v7615_v29  ;;  %v9297_v20 = vld [vmem:[#allocation4_spill] sm:$0xff]  ;;  %v9298_v37 = vld [vmem:[#allocation5_spill] sm:$0xff]  ;;  %v9299_v29 = vld [vmem:[#allocation6_spill] sm:$0xff]  ;;  %v9304_v62 = vand.u32 4294901760, %v7541_v14 }
  0x39   : > { %v544_v28 = vand.u32 4294901760, %v543_v50  ;;  %v9300_v38 = vld [vmem:[#allocation7_spill] sm:$0xff] }
  0x3a   : > { %5493 = vmatmul.mubr.f32.gmra.mrb[4].mxu0 %v415_v45 }
  0x3b   : > { %6505 = vmatpush3.bf16.msra.mxu0 %v7575_v46  ;;  %5495 = vmatprep.mubr.f32.mxu0 %v425_v18  ;;  %v550_v46 = vsub.f32 %v7626_v30, %v549_v25  ;;  %v6534_v25 = vpack.c.bf16 %v7443_v36, %v7441_v35  ;;  %v6554_v35 = vpack.c.bf16 %v7626_v30, %v7623_v41  ;;  %v9291_v36 = vld [vmem:[#allocation8_spill] sm:$0xff]  ;;  %v9292_v41 = vld [vmem:[#allocation2_spill] sm:$0xff]  ;;  %v9302_v30 = vand.u32 4294901760, %v7531_v11  ;;  %v1227_v18 = vld [vmem:[%s9202_s2 + $0x28] sm:$0xff] }
  0x3c   : > { %6507 = vmatprep.subr.bf16.mxu0 %v6506_v40  ;;  %v9305_v3 = vand.u32 4294901760, %v9291_v36 }
  0x3d   : > { %v551_v45 = vand.u32 4294901760, %v550_v46 }
  0x3e   : > { %5496 = vmatmul.mubr.f32.gmra.mrb[6].mxu0 %v435_v55  ;;  %v1255_v55 = vsel %vm1238_vm0, %v1227_v18, 0 }
  0x3f   : > { %6509 = vmatpush3.bf16.msra.mxu0 %v6506_v40  ;;  %5530 = vmatprep.mubr.f32.mxu0 %v7407_v22  ;;  %v6522_v6 = vpack.c.bf16 %v551_v45, %v544_v28  ;;  %v7861_v56 = vand.u32 4294901760, %v1255_v55 }
  0x40   : > { %6511 = vmatprep.subr.bf16.mxu0 %v6510_v15 }
  0x43   : > { %6513 = vmatpush3.bf16.msra.mxu0 %v6510_v15 }
  0x44   : > { %6515 = vmatprep.subr.bf16.mxu0 %v6514_v17 }
  0x47   : > { %6517 = vmatpush3.bf16.msra.mxu0 %v6514_v17 }
  0x48   : > { %6519 = vmatprep.subr.bf16.mxu0 %v6518_v47 }
  0x4b   : > { %6521 = vmatpush3.bf16.msra.mxu0 %v6518_v47  ;;  %v1258_v47 = vsel %vm1238_vm0, %v1228_v61, 0 }
  0x4c   : > { %6523 = vmatprep.subr.bf16.mxu0 %v6522_v6 }
  0x4f   : > { %6525 = vmatpush3.bf16.msra.mxu0 %v6522_v6 }
  0x50   : > { %6527 = vmatprep.subr.bf16.mxu0 %v6526_v24 }
  0x52   : > { %5531 = vmatmul.mubr.f32.vlgmr.msra.gmra.mrb[0].mxu0 %v7439_v34 }
  0x53   : > { %6529 = vmatpush3.bf16.msra.mxu0 %v6526_v24  ;;  %5533 = vmatprep.mubr.f32.mxu0 %v7498_v59 }
  0x54   : > { %6531 = vmatprep.subr.bf16.mxu0 %v6530_v63 }
  0x56   : > { %5534 = vmatmul.mubr.f32.gmra.mrb[2].mxu0 %v7522_v4 }
  0x57   : > { %6533 = vmatpush3.bf16.msra.mxu0 %v6530_v63  ;;  %5536 = vmatprep.mubr.f32.mxu0 %v7533_v12  ;;  %v7886_v63 = vsub.f32 %v1255_v55, %v7861_v56 }
  0x58   : > { %6535 = vmatprep.subr.bf16.mxu0 %v6534_v25 }
  0x5a   : > { %5537 = vmatmul.mubr.f32.gmra.mrb[4].mxu0 %v7570_v51 }
  0x5b   : > { %6537 = vmatpush3.bf16.msra.mxu0 %v6534_v25  ;;  %5539 = vmatprep.mubr.f32.mxu0 %v7572_v19  ;;  %v1261_v25 = vsel %vm1238_vm0, %v1229_v39, 0 }
  0x5c   : > { %6539 = vmatprep.subr.bf16.mxu0 %v6538_v26 }
  0x5e   : > { %5540 = vmatmul.mubr.f32.gmra.mrb[6].mxu0 %v7601_v52 }
  0x5f   : > { %6541 = vmatpush3.bf16.msra.mxu0 %v6538_v26  ;;  %5574 = vmatprep.mubr.f32.mxu0 %v7433_v31  ;;  %v9301_v31 = vand.u32 4294901760, %v7475_v49 }
  0x60   : > { %6543 = vmatprep.subr.bf16.mxu0 %v6542_v27 }
  0x63   : > { %6545 = vmatpush3.bf16.msra.mxu0 %v6542_v27 }
  0x64   : > { %6547 = vmatprep.subr.bf16.mxu0 %v6546_v32 }
  0x67   : > { %6549 = vmatpush3.bf16.msra.mxu0 %v6546_v32  ;;  %v7890_v32 = vand.u32 4294901760, %v1258_v47 }
  0x68   : > { %6551 = vmatprep.subr.bf16.mxu0 %v6550_v33 }
  0x6b   : > { %6553 = vmatpush3.bf16.msra.mxu0 %v6550_v33 }
  0x6c   : > { %6555 = vmatprep.subr.bf16.mxu0 %v6554_v35 }
  0x6f   : > { %6557 = vmatpush3.bf16.msra.mxu0 %v6554_v35 }
  0x70   : > { %6559 = vmatprep.subr.bf16.mxu0 %v7363_v10 }
  0x72   : > { %5575 = vmatmul.mubr.f32.vlgmr.msra.gmra.mrb[0].mxu0 %v7475_v49  ;;  %v9306_v49 = vand.u32 4294901760, %v9293_v7 }
  0x73   : > { %6561 = vmatpush3.bf16.msra.mxu0 %v7363_v10  ;;  %5577 = vmatprep.mubr.f32.mxu0 %v7531_v11  ;;  %v9308_v11 = vand.u32 4294901760, %v7631_v43 }
  0x74   : > { %6563 = vmatprep.subr.bf16.mxu0 %v7365_v13 }
  0x76   : > { %5578 = vmatmul.mubr.f32.gmra.mrb[2].mxu0 %v7541_v14 }
  0x77   : > { %6565 = vmatpush3.bf16.msra.mxu0 %v7365_v13  ;;  %5580 = vmatprep.mubr.f32.mxu0 %v9291_v36 }
  0x78   : > { %6567 = vmatprep.subr.bf16.mxu0 %v9292_v41 }
  0x7a   : > { %5581 = vmatmul.mubr.f32.gmra.mrb[4].mxu0 %v9293_v7 }
  0x7b   : > { %6569 = vmatpush3.bf16.msra.mxu0 %v9292_v41  ;;  %5583 = vmatprep.mubr.f32.mxu0 %v9294_v57 }
  0x7c   : > { %6571 = vmatprep.subr.bf16.mxu0 %v9295_v53 }
  0x7e   : > { %5584 = vmatmul.mubr.f32.gmra.mrb[6].mxu0 %v7631_v43 }
  0x7f   : > { %6573 = vmatpush3.bf16.msra.mxu0 %v9295_v53  ;;  %5618 = vmatprep.mubr.f32.mxu0 %v9296_v0 }
  0x80   : > { %6575 = vmatprep.subr.bf16.mxu0 %v9297_v20 }
  0x83   : > { %6577 = vmatpush3.bf16.msra.mxu0 %v9297_v20 }
  0x84   : > { %6579 = vmatprep.subr.bf16.mxu0 %v9298_v37 }
  0x87   : > { %6581 = vmatpush3.bf16.msra.mxu0 %v9298_v37 }
  0x88   : > { %6583 = vmatprep.subr.bf16.mxu0 %v9299_v29 }
  0x8b   : > { %6585 = vmatpush3.bf16.msra.mxu0 %v9299_v29 }
  0x8c   : > { %6587 = vmatprep.subr.bf16.mxu0 %v9300_v38 }
  0x8f   : > { %6589 = vmatpush3.bf16.msra.mxu0 %v9300_v38 }
  0x90   : > { %6591 = vmatprep.subr.bf16.mxu0 %v7655_v42 }
  0x92   : > { %5619 = vmatmul.mubr.f32.vlgmr.msra.gmra.mrb[0].mxu0 %v9301_v31 }
  0x93   : > { %6593 = vmatpush3.bf16.msra.mxu0 %v7655_v42  ;;  %5621 = vmatprep.mubr.f32.mxu0 %v9302_v30  ;;  %v9307_v42 = vand.u32 4294901760, %v9294_v57  ;;  %v1230_v57 = vld [vmem:[%s9202_s2 + $0x40] sm:$0xff]  ;;  %v9241_v30 = vand.u32 4294901760, %v7886_v63 }
  0x94   : > { %6595 = vmatprep.subr.bf16.mxu0 %v9303_v2 }
  0x96   : > { %5622 = vmatmul.mubr.f32.gmra.mrb[2].mxu0 %v9304_v62 }
  0x97   : > { %6597 = vmatpush3.bf16.msra.mxu0 %v9303_v2  ;;  %5624 = vmatprep.mubr.f32.mxu0 %v9305_v3 }
  0x98   : > { %6599 = vmatprep.subr.bf16.mxu0 %v7667_v16 }
  0x9a   : > { %5625 = vmatmul.mubr.f32.gmra.mrb[4].mxu0 %v9306_v49  ;;  %v7908_v49 = vsub.f32 %v1258_v47, %v7890_v32 }
  0x9b   : > { %6601 = vmatpush3.bf16.msra.mxu0 %v7667_v16  ;;  %5627 = vmatprep.mubr.f32.mxu0 %v9307_v42  ;;  %v1264_v42 = vsel %vm1238_vm0, %v1230_v57, 0 }
  0x9c   : > { %6603 = vmatprep.subr.bf16.mxu0 %v7669_v21 }
  0x9e   : > { %5628 = vmatmul.mubr.f32.gmra.mrb[6].mxu0 %v9308_v11 }
  0x9f   : > { %6605 = vmatpush3.bf16.msra.mxu0 %v7669_v21  ;;  %5662 = vmatprep.mubr.f32.mxu0 %v7407_v22 }
  0xa0   : > { %6607 = vmatprep.subr.bf16.mxu0 %v7671_v1 }
  0xa3   : > { %6609 = vmatpush3.bf16.msra.mxu0 %v7671_v1  ;;  %v1223_v1 = vld [vmem:[%s9202_s2 + $0x8] sm:$0xff] }
  0xa4   : > { %6611 = vmatprep.subr.bf16.mxu0 %v7673_v60  ;;  %v1243_v21 = vsel %vm1238_vm0, %v1223_v1, 0 }
  0xa7   : > { %6613 = vmatpush3.bf16.msra.mxu0 %v7673_v60  ;;  %v1226_v60 = vld [vmem:[%s9202_s2 + $0x20] sm:$0xff] }
  0xa8   : > { %6615 = vmatprep.subr.bf16.mxu0 %v7677_v58  ;;  %v1252_v23 = vsel %vm1238_vm0, %v1226_v60, 0 }
  0xa9   : > { %v7855_v9 = vand.u32 4294901760, %v1252_v23 }
  0xab   : > { %6617 = vmatpush3.bf16.msra.mxu0 %v7677_v58  ;;  %v7877_v46 = vsub.f32 %v1252_v23, %v7855_v9 }
  0xac   : > { %6619 = vmatprep.subr.bf16.mxu0 %v7679_v44 }
  0xad   : > { %v9239_v7 = vand.u32 4294901760, %v7877_v46 }
  0xaf   : > { %6621 = vmatpush3.bf16.msra.mxu0 %v7679_v44  ;;  %v7830_v44 = vand.u32 4294901760, %v1243_v21 }
  0xb0   : > { %6623 = vmatprep.subr.bf16.mxu0 %v7363_v10 }
  0xb1   : > { %v7840_v58 = vsub.f32 %v1243_v21, %v7830_v44 }
  0xb2   : > { %5663 = vmatmul.mubr.f32.vlgmr.msra.gmra.mrb[0].mxu0 %v7439_v34 }
  0xb3   : > { %6625 = vmatpush3.bf16.msra.mxu0 %v7363_v10  ;;  %5665 = vmatprep.mubr.f32.mxu0 %v7498_v59  ;;  %v1222_v10 = vld [vmem:[%s9202_s2] sm:$0xff]  ;;  %v1372_v54 = vand.u32 4294901760, %v7840_v58 }
  0xb4   : > { %6627 = vmatprep.subr.bf16.mxu0 %v7365_v13 }
  0xb5   : > { %v7866_v17 = vsub.f32 %v7840_v58, %v1372_v54 }
  0xb6   : > { %5666 = vmatmul.mubr.f32.gmra.mrb[2].mxu0 %v7522_v4 }
  0xb7   : > { %6629 = vmatpush3.bf16.msra.mxu0 %v7365_v13  ;;  %5668 = vmatprep.mubr.f32.mxu0 %v7533_v12  ;;  %v1240_v13 = vsel %vm1238_vm0, %v1222_v10, 0  ;;  %v1374_v27 = vand.u32 4294901760, %v7866_v17 }
  0xb8   : > { %6631 = vmatprep.subr.bf16.mxu0 %v9292_v41  ;;  %v7809_v16 = vand.u32 4294901760, %v1240_v13 }
  0xba   : > { %5669 = vmatmul.mubr.f32.gmra.mrb[4].mxu0 %v7570_v51 }
  0xbb   : > { %6633 = vmatpush3.bf16.msra.mxu0 %v9292_v41  ;;  %5671 = vmatprep.mubr.f32.mxu0 %v7572_v19 }
  0xbc   : > { %6635 = vmatprep.subr.bf16.mxu0 %v9295_v53 }
  0xbe   : > { %5672 = vmatmul.mubr.f32.gmra.mrb[6].mxu0 %v7601_v52 }
  0xbf   : > { %6637 = vmatpush3.bf16.msra.mxu0 %v9295_v53  ;;  %5706 = vmatprep.mubr.f32.mxu0 %v7407_v22  ;;  %v7812_v22 = vsub.f32 %v1240_v13, %v7809_v16 }
  0xc0   : > { %6639 = vmatprep.subr.bf16.mxu0 %v9297_v20 }
  0xc3   : > { %6641 = vmatpush3.bf16.msra.mxu0 %v9297_v20 }
  0xc4   : > { %6643 = vmatprep.subr.bf16.mxu0 %v9298_v37 }
  0xc7   : > { %6645 = vmatpush3.bf16.msra.mxu0 %v9298_v37 }
  0xc8   : > { %6647 = vmatprep.subr.bf16.mxu0 %v9299_v29 }
  0xcb   : > { %6649 = vmatpush3.bf16.msra.mxu0 %v9299_v29  ;;  %v7900_v29 = vand.u32 4294901760, %v1261_v25 }
  0xcc   : > { %6651 = vmatprep.subr.bf16.mxu0 %v9300_v38 }
  0xcf   : > { %6653 = vmatpush3.bf16.msra.mxu0 %v9300_v38 }
  0xd2   : > { %5707 = vmatmul.mubr.f32.vlgmr.msra.gmra.mrb[0].mxu0 %v7439_v34  ;;  %v1362_v34 = vand.u32 4294901760, %v7812_v22 }
  0xd3   : > { %5709 = vmatprep.mubr.f32.mxu0 %v7498_v59 }
  0xd6   : > { %5710 = vmatmul.mubr.f32.gmra.mrb[2].mxu0 %v7522_v4  ;;  %v1224_v4 = vld [vmem:[%s9202_s2 + $0x10] sm:$0xff] }
  0xd7   : > { %5712 = vmatprep.mubr.f32.mxu0 %v7533_v12  ;;  %v1225_v12 = vld [vmem:[%s9202_s2 + $0x18] sm:$0xff]  ;;  %v1246_v14 = vsel %vm1238_vm0, %v1224_v4, 0 }
  0xda   : > { %5713 = vmatmul.mubr.f32.gmra.mrb[4].mxu0 %v7570_v51  ;;  %v1363_v51 = vsub.f32 %v7812_v22, %v1362_v34 }
  0xdb   : > { %5715 = vmatprep.mubr.f32.mxu0 %v7572_v19  ;;  %v1249_v19 = vsel %vm1238_vm0, %v1225_v12, 0 }
  0xdc   : > { %v1364_v59 = vand.u32 4294901760, %v1363_v51  ;;  %v7834_v43 = vand.u32 4294901760, %v1249_v19 }
  0xde   : > { %5716 = vmatmul.mubr.f32.gmra.mrb[6].mxu0 %v7601_v52  ;;  %5734 = vmatprep.mubr.f32.mxu1 %v1364_v59  ;;  %v7832_v52 = vand.u32 4294901760, %v1246_v14  ;;  %v7849_v40 = vsub.f32 %v1249_v19, %v7834_v43  ;;  %v1231_v59 = vld [vmem:[%s9202_s2 + $0x48] sm:$0xff]  ;;  %v7919_v19 = vsub.f32 %v1261_v25, %v7900_v29 }
  0xdf   : > { %v1267_v47 = vsel %vm1238_vm0, %v1231_v59, 0 }
  0xe0   : > { %v7843_v8 = vsub.f32 %v1246_v14, %v7832_v52  ;;  %v9242_v15 = vand.u32 4294901760, %v7849_v40 }
  0xe2   : > { %v1382_v5 = vand.u32 4294901760, %v7843_v8  ;;  %v7883_v6 = vsub.f32 %v7849_v40, %v9242_v15 }
  0xe4   : > { %v7874_v50 = vsub.f32 %v7843_v8, %v1382_v5  ;;  %v1394_v37 = vand.u32 4294901760, %v7883_v6 }
  0xe6   : > { %v1384_v41 = vand.u32 4294901760, %v7874_v50 }
 0x1a5   : > { %v5708_v48 = vpop.f32.mrb[0].mxu0 }
 0x1a6   : > { %v1291_v28 = vand.u32 4294901760, %v5708_v48  ;;  %v1176_v45 = vpop.f32.mrb[1].mxu0 }
 0x1a7   : > { %v1288_v24 = vand.u32 4294901760, %v1176_v45 }
 0x1a8   : > { %v1529_v26 = vsub.f32 %v5708_v48, %v1291_v28  ;;  %v7925_v48 = vand.u32 4294901760, %v1264_v42 }
 0x1a9   : > { %v7892_v33 = vpack.c.bf16 %v1291_v28, %v1288_v24  ;;  %v1522_v35 = vsub.f32 %v1176_v45, %v1288_v24  ;;  %v5711_v36 = vpop.f32.mrb[2].mxu0 }
 0x1aa   : > { %v1530_v53 = vand.u32 4294901760, %v1529_v26  ;;  %v1297_v0 = vand.u32 4294901760, %v5711_v36  ;;  %v1188_v20 = vpop.f32.mrb[3].mxu0 }
 0x1ab   : > { %v1523_v38 = vand.u32 4294901760, %v1522_v35  ;;  %v1294_v31 = vand.u32 4294901760, %v1188_v20  ;;  %6655 = vmatprep.subr.bf16.mxu1 %v7892_v33  ;;  %v7904_v2 = vpack.c.bf16 %v1529_v26, %v1522_v35 }
 0x1ac   : > { %v1531_v62 = vsub.f32 %v1529_v26, %v1530_v53  ;;  %v1543_v3 = vsub.f32 %v5711_v36, %v1297_v0  ;;  %6657 = vmatpush3.bf16.msra.mxu1 %v7892_v33 }
 0x1ad   : > { %v1524_v11 = vsub.f32 %v1522_v35, %v1523_v38  ;;  %v7911_v10 = vpack.c.bf16 %v1297_v0, %v1294_v31  ;;  %v1536_v13 = vsub.f32 %v1188_v20, %v1294_v31  ;;  %v5714_v51 = vpop.f32.mrb[4].mxu0  ;;  %v7916_v1 = vpack.c.bf16 %v1530_v53, %v1523_v38  ;;  %v1232_v35 = vld [vmem:[%s9202_s2 + $0x50] sm:$0xff] }
 0x1ae   : > { %v1544_v4 = vand.u32 4294901760, %v1543_v3  ;;  %v1303_v12 = vand.u32 4294901760, %v5714_v51  ;;  %v1200_v21 = vpop.f32.mrb[5].mxu0  ;;  %v1532_v14 = vand.u32 4294901760, %v1531_v62  ;;  %v1270_v59 = vsel %vm1238_vm0, %v1232_v35, 0 }
 0x1af   : > { %v1537_v60 = vand.u32 4294901760, %v1536_v13  ;;  %v1300_v18 = vand.u32 4294901760, %v1200_v21  ;;  %6659 = vmatprep.subr.bf16.mxu1 %v7911_v10  ;;  %v1525_v23 = vand.u32 4294901760, %v1524_v11  ;;  %v7922_v55 = vpack.c.bf16 %v1543_v3, %v1536_v13 }
 0x1b0   : > { %v1545_v61 = vsub.f32 %v1543_v3, %v1544_v4  ;;  %v1557_v39 = vsub.f32 %v5714_v51, %v1303_v12  ;;  %6661 = vmatpush3.bf16.msra.mxu1 %v7911_v10  ;;  %v9240_v51 = vand.u32 4294901760, %v7908_v49  ;;  %v7955_v35 = vsub.f32 %v1264_v42, %v7925_v48  ;;  %v1235_v42 = vld [vmem:[%s9202_s2 + $0x68] sm:$0xff] }
 0x1b1   : > { %v1538_v28 = vsub.f32 %v1536_v13, %v1537_v60  ;;  %v7928_v45 = vpack.c.bf16 %v1303_v12, %v1300_v18  ;;  %v1550_v24 = vsub.f32 %v1200_v21, %v1300_v18  ;;  %v5717_v25 = vpop.f32.mrb[6].mxu0  ;;  %v6670_v26 = vpack.c.bf16 %v1532_v14, %v1525_v23 }
 0x1b2   : > { %v1558_v36 = vand.u32 4294901760, %v1557_v39  ;;  %v1309_v57 = vand.u32 4294901760, %v5717_v25  ;;  %v1212_v53 = vpop.f32.mrb[7].mxu0  ;;  %v1546_v0 = vand.u32 4294901760, %v1545_v61  ;;  %v7933_v20 = vpack.c.bf16 %v1544_v4, %v1537_v60  ;;  %v1233_v60 = vld [vmem:[%s9202_s2 + $0x58] sm:$0xff] }
 0x1b3   : > { %v1551_v38 = vand.u32 4294901760, %v1550_v24  ;;  %v1306_v31 = vand.u32 4294901760, %v1212_v53  ;;  %6663 = vmatprep.subr.bf16.mxu1 %v7928_v45  ;;  %v1539_v62 = vand.u32 4294901760, %v1538_v28  ;;  %v7936_v3 = vpack.c.bf16 %v1557_v39, %v1550_v24 }
 0x1b4   : > { %v1559_v11 = vsub.f32 %v1557_v39, %v1558_v36  ;;  %v1571_v13 = vsub.f32 %v5717_v25, %v1309_v57  ;;  %6665 = vmatpush3.bf16.msra.mxu1 %v7928_v45  ;;  %v7946_v61 = vand.u32 4294901760, %v1267_v47  ;;  %v1234_v39 = vld [vmem:[%s9202_s2 + $0x60] sm:$0xff]  ;;  %v1279_v17 = vsel %vm1238_vm0, %v1235_v42, 0 }
 0x1b5   : > { %v1552_v12 = vsub.f32 %v1550_v24, %v1551_v38  ;;  %v7941_v21 = vpack.c.bf16 %v1309_v57, %v1306_v31  ;;  %v1564_v4 = vsub.f32 %v1212_v53, %v1306_v31  ;;  %v6674_v14 = vpack.c.bf16 %v1546_v0, %v1539_v62 }
 0x1b6   : > { %v1572_v18 = vand.u32 4294901760, %v1571_v13  ;;  %v1560_v23 = vand.u32 4294901760, %v1559_v11  ;;  %v7951_v28 = vpack.c.bf16 %v1558_v36, %v1551_v38  ;;  %v1403_v0 = vsub.f32 %v7877_v46, %v9239_v7 }
 0x1b7   : > { %v1565_v25 = vand.u32 4294901760, %v1564_v4  ;;  %6667 = vmatprep.subr.bf16.mxu1 %v7941_v21  ;;  %v1553_v24 = vand.u32 4294901760, %v1552_v12  ;;  %v7957_v57 = vpack.c.bf16 %v1571_v13, %v1564_v4  ;;  %v7963_v31 = vand.u32 4294901760, %v1270_v59 }
 0x1b8   : > { %v1573_v53 = vsub.f32 %v1571_v13, %v1572_v18  ;;  %6669 = vmatpush3.bf16.msra.mxu1 %v7941_v21  ;;  %v1273_v36 = vsel %vm1238_vm0, %v1233_v60, 0  ;;  %v1276_v11 = vsel %vm1238_vm0, %v1234_v39, 0  ;;  %v1413_v12 = vsub.f32 %v7886_v63, %v9241_v30 }
 0x1b9   : > { %v1566_v38 = vsub.f32 %v1564_v4, %v1565_v25  ;;  %6671 = vmatprep.subr.bf16.mxu1 %v6670_v26  ;;  %v6678_v62 = vpack.c.bf16 %v1560_v23, %v1553_v24  ;;  %v7970_v13 = vpack.c.bf16 %v1572_v18, %v1565_v25  ;;  %v1423_v60 = vsub.f32 %v7908_v49, %v9240_v51  ;;  %v1236_v23 = vld [vmem:[%s9202_s2 + $0x70] sm:$0xff] }
 0x1ba   : > { %v1574_v7 = vand.u32 4294901760, %v1573_v53  ;;  %v1432_v4 = vand.u32 4294901760, %v7919_v19  ;;  %v1442_v39 = vand.u32 4294901760, %v7955_v35  ;;  %v7986_v25 = vsub.f32 %v1267_v47, %v7946_v61  ;;  %v1237_v47 = vld [vmem:[%s9202_s2 + $0x78] sm:$0xff] }
 0x1bb   : > { %5735 = vmatmul.mubr.f32.vlgmr.msra.gmra.mrb[0].mxu1 %v1374_v27  ;;  %v1567_v18 = vand.u32 4294901760, %v1566_v38  ;;  %v7988_v24 = vand.u32 4294901760, %v1273_v36  ;;  %v1404_v53 = vand.u32 4294901760, %v1403_v0  ;;  %v7993_v51 = vsub.f32 %v1270_v59, %v7963_v31 }
 0x1bc   : > { %6673 = vmatpush3.bf16.msra.mxu1 %v6670_v26  ;;  %5737 = vmatprep.mubr.f32.mxu1 %v1384_v41  ;;  %v7995_v30 = vand.u32 4294901760, %v1276_v11  ;;  %v1282_v38 = vsel %vm1238_vm0, %v1236_v23, 0  ;;  %v1414_v26 = vand.u32 4294901760, %v1413_v12  ;;  %v1424_v15 = vand.u32 4294901760, %v1423_v60 }
 0x1bd   : > { %6675 = vmatprep.subr.bf16.mxu1 %v6674_v14  ;;  %v6682_v27 = vpack.c.bf16 %v1574_v7, %v1567_v18  ;;  %v1433_v50 = vsub.f32 %v7919_v19, %v1432_v4  ;;  %v1443_v41 = vsub.f32 %v7955_v35, %v1442_v39  ;;  %v1452_v7 = vand.u32 4294901760, %v7986_v25 }
 0x1be   : > { %v8012_v59 = vsub.f32 %v1273_v36, %v7988_v24  ;;  %v8014_v0 = vand.u32 4294901760, %v1279_v17  ;;  %v9243_v42 = vand.u32 4294901760, %v7993_v51  ;;  %v8018_v12 = vsub.f32 %v1276_v11, %v7995_v30 }
 0x1bf   : > { %5738 = vmatmul.mubr.f32.gmra.mrb[2].mxu1 %v1394_v37  ;;  %v8020_v6 = vand.u32 4294901760, %v1282_v38  ;;  %v1285_v37 = vsel %vm1238_vm0, %v1237_v47, 0  ;;  %v1434_v60 = vand.u32 4294901760, %v1433_v50  ;;  %v1453_v36 = vsub.f32 %v7986_v25, %v1452_v7 }
 0x1c0   : > { %6677 = vmatpush3.bf16.msra.mxu1 %v6674_v14  ;;  %5740 = vmatprep.mubr.f32.mxu1 %v1404_v53  ;;  %v1472_v23 = vand.u32 4294901760, %v8012_v59  ;;  %v8028_v14 = vsub.f32 %v1279_v17, %v8014_v0  ;;  %v8030_v18 = vand.u32 4294901760, %v1285_v37  ;;  %v1444_v11 = vand.u32 4294901760, %v1443_v41 }
 0x1c1   : > { %6679 = vmatprep.subr.bf16.mxu1 %v6678_v62  ;;  %v1463_v53 = vsub.f32 %v7993_v51, %v9243_v42  ;;  %v9244_v47 = vand.u32 4294901760, %v8018_v12  ;;  %v1454_v50 = vand.u32 4294901760, %v1453_v36 }
 0x1c2   : > { %v1473_v17 = vsub.f32 %v8012_v59, %v1472_v23 }
 0x1c3   : > { %5741 = vmatmul.mubr.f32.gmra.mrb[4].mxu1 %v1414_v26  ;;  %v8037_v26 = vsub.f32 %v1282_v38, %v8020_v6  ;;  %v1464_v41 = vand.u32 4294901760, %v1463_v53  ;;  %v1483_v38 = vsub.f32 %v8018_v12, %v9244_v47 }
 0x1c4   : > { %6681 = vmatpush3.bf16.msra.mxu1 %v6678_v62  ;;  %5743 = vmatprep.mubr.f32.mxu1 %v1424_v15  ;;  %v1492_v62 = vand.u32 4294901760, %v8028_v14  ;;  %v8044_v15 = vsub.f32 %v1285_v37, %v8030_v18 }
 0x1c5   : > { %6683 = vmatprep.subr.bf16.mxu1 %v6682_v27  ;;  %v1502_v42 = vand.u32 4294901760, %v8037_v26 }
 0x1c6   : > { %v1493_v36 = vsub.f32 %v8028_v14, %v1492_v62  ;;  %v1512_v37 = vand.u32 4294901760, %v8044_v15 }
 0x1c7   : > { %5744 = vmatmul.mubr.f32.gmra.mrb[6].mxu1 %v1434_v60  ;;  %v1474_v60 = vand.u32 4294901760, %v1473_v17 }
 0x1c8   : > { %6685 = vmatpush3.bf16.msra.mxu1 %v6682_v27  ;;  %5746 = vmatprep.mubr.f32.mxu1 %v1444_v11  ;;  %v1484_v27 = vand.u32 4294901760, %v1483_v38  ;;  %v1503_v11 = vsub.f32 %v8037_v26, %v1502_v42  ;;  %v1494_v53 = vand.u32 4294901760, %v1493_v36  ;;  %v1513_v47 = vsub.f32 %v8044_v15, %v1512_v37  ;;  %v2559_v36 = vld [vmem:[%s9204_s4 + $0x8] sm:$0xff] }
 0x1c9   : > { %6687 = vmatprep.subr.bf16.mxu1 %v7904_v2 }
 0x1ca   : > { %v1514_v17 = vand.u32 4294901760, %v1513_v47 }
 0x1cb   : > { %5747 = vmatmul.mubr.f32.gmra.mrb[8].mxu1 %v1454_v50  ;;  %v1504_v50 = vand.u32 4294901760, %v1503_v11  ;;  %v2561_v11 = vld [vmem:[%s9204_s4 + $0x18] sm:$0xff] }
 0x1cc   : > { %5749 = vmatprep.mubr.f32.mxu1 %v1464_v41 }
 0x1cf   : > { %5750 = vmatmul.mubr.f32.gmra.mrb[10].mxu1 %v1474_v60 }
 0x1d0   : > { %5752 = vmatprep.mubr.f32.mxu1 %v1484_v27  ;;  %v2578_v27 = vsel %vm1238_vm0, %v2559_v36, 0 }
 0x1d3   : > { %5753 = vmatmul.mubr.f32.gmra.mrb[12].mxu1 %v1494_v53 }
 0x1d4   : > { %5755 = vmatprep.mubr.f32.mxu1 %v1504_v50  ;;  %v8253_v50 = vand.u32 4294901760, %v2578_v27 }
 0x1d7   : > { %5756 = vmatmul.mubr.f32.gmra.mrb[14].mxu1 %v1514_v17  ;;  %v2584_v17 = vsel %vm1238_vm0, %v2561_v11, 0 }
 0x1d8   : > { %5774 = vmatprep.mubr.f32.mxu1 %v7809_v16 }
 0x1db   : > { %5775 = vmatmul.mubr.f32.vlgmr.msra.gmra.mrb[0].mxu1 %v7830_v44 }
 0x1dc   : > { %6689 = vmatpush3.bf16.msra.mxu1 %v7904_v2  ;;  %5777 = vmatprep.mubr.f32.mxu1 %v7832_v52  ;;  %v9309_v2 = vand.u32 4294901760, %v7849_v40 }
 0x1dd   : > { %6691 = vmatprep.subr.bf16.mxu1 %v7922_v55 }
 0x1df   : > { %5778 = vmatmul.mubr.f32.gmra.mrb[2].mxu1 %v7834_v43 }
 0x1e0   : > { %6693 = vmatpush3.bf16.msra.mxu1 %v7922_v55  ;;  %5780 = vmatprep.mubr.f32.mxu1 %v7855_v9  ;;  %v9310_v55 = vand.u32 4294901760, %v7877_v46 }
 0x1e1   : > { %6695 = vmatprep.subr.bf16.mxu1 %v7936_v3 }
 0x1e3   : > { %5781 = vmatmul.mubr.f32.gmra.mrb[4].mxu1 %v7861_v56 }
 0x1e4   : > { %6697 = vmatpush3.bf16.msra.mxu1 %v7936_v3  ;;  %5783 = vmatprep.mubr.f32.mxu1 %v7890_v32 }
 0x1e5   : > { %6699 = vmatprep.subr.bf16.mxu1 %v7957_v57 }
 0x1e7   : > { %5784 = vmatmul.mubr.f32.gmra.mrb[6].mxu1 %v7900_v29 }
 0x1e8   : > { %6701 = vmatpush3.bf16.msra.mxu1 %v7957_v57  ;;  %5786 = vmatprep.mubr.f32.mxu1 %v7925_v48 }
 0x1e9   : > { %6703 = vmatprep.subr.bf16.mxu1 %v7892_v33 }
 0x1eb   : > { %5787 = vmatmul.mubr.f32.gmra.mrb[8].mxu1 %v7946_v61 }
 0x1ec   : > { %5789 = vmatprep.mubr.f32.mxu1 %v7963_v31 }
 0x1ef   : > { %5790 = vmatmul.mubr.f32.gmra.mrb[10].mxu1 %v7988_v24 }
 0x1f0   : > { %5792 = vmatprep.mubr.f32.mxu1 %v7995_v30 }
 0x1f3   : > { %5793 = vmatmul.mubr.f32.gmra.mrb[12].mxu1 %v8014_v0 }
 0x1f4   : > { %5795 = vmatprep.mubr.f32.mxu1 %v8020_v6 }
 0x1f7   : > { %5796 = vmatmul.mubr.f32.gmra.mrb[14].mxu1 %v8030_v18 }
 0x1f8   : > { %5814 = vmatprep.mubr.f32.mxu1 %v7812_v22  ;;  %v9311_v22 = vand.u32 4294901760, %v7886_v63 }
 0x1fb   : > { %5815 = vmatmul.mubr.f32.vlgmr.msra.gmra.mrb[0].mxu1 %v7840_v58  ;;  %v9313_v58 = vand.u32 4294901760, %v7993_v51 }
 0x1fc   : > { %6705 = vmatpush3.bf16.msra.mxu1 %v7892_v33  ;;  %5817 = vmatprep.mubr.f32.mxu1 %v7843_v8  ;;  %v9314_v8 = vand.u32 4294901760, %v8018_v12 }
 0x1fd   : > { %6707 = vmatprep.subr.bf16.mxu1 %v7911_v10 }
 0x1ff   : > { %5818 = vmatmul.mubr.f32.gmra.mrb[2].mxu1 %v7849_v40 }
 0x200   : > { %6709 = vmatpush3.bf16.msra.mxu1 %v7911_v10  ;;  %5820 = vmatprep.mubr.f32.mxu1 %v7877_v46 }
 0x201   : > { %6711 = vmatprep.subr.bf16.mxu1 %v7928_v45 }
 0x203   : > { %5821 = vmatmul.mubr.f32.gmra.mrb[4].mxu1 %v7886_v63 }
 0x204   : > { %6713 = vmatpush3.bf16.msra.mxu1 %v7928_v45  ;;  %5823 = vmatprep.mubr.f32.mxu1 %v7908_v49 }
 0x205   : > { %6715 = vmatprep.subr.bf16.mxu1 %v7941_v21 }
 0x207   : > { %5824 = vmatmul.mubr.f32.gmra.mrb[6].mxu1 %v7919_v19  ;;  %v7297_v19 = vmov 1.0  }
 0x208   : > { %6717 = vmatpush3.bf16.msra.mxu1 %v7941_v21  ;;  %5826 = vmatprep.mubr.f32.mxu1 %v7955_v35 }
 0x209   : > { %6719 = vmatprep.subr.bf16.mxu1 %v7916_v1 }
 0x20b   : > { %5827 = vmatmul.mubr.f32.gmra.mrb[8].mxu1 %v7986_v25 }
 0x20c   : > { %5829 = vmatprep.mubr.f32.mxu1 %v7993_v51 }
 0x20f   : > { %5830 = vmatmul.mubr.f32.gmra.mrb[10].mxu1 %v8012_v59 }
 0x210   : > { %5832 = vmatprep.mubr.f32.mxu1 %v8018_v12 }
 0x213   : > { %5833 = vmatmul.mubr.f32.gmra.mrb[12].mxu1 %v8028_v14 }
 0x214   : > { %5835 = vmatprep.mubr.f32.mxu1 %v8037_v26 }
 0x217   : > { %5836 = vmatmul.mubr.f32.gmra.mrb[14].mxu1 %v8044_v15 }
 0x218   : > { %5854 = vmatprep.mubr.f32.mxu1 %v1362_v34  ;;  %v9312_v34 = vand.u32 4294901760, %v7908_v49 }
 0x21b   : > { %5855 = vmatmul.mubr.f32.vlgmr.msra.gmra.mrb[0].mxu1 %v1372_v54 }
 0x21c   : > { %6721 = vmatpush3.bf16.msra.mxu1 %v7916_v1  ;;  %5857 = vmatprep.mubr.f32.mxu1 %v1382_v5 }
 0x21d   : > { %6723 = vmatprep.subr.bf16.mxu1 %v7933_v20 }
 0x21f   : > { %5858 = vmatmul.mubr.f32.gmra.mrb[2].mxu1 %v9309_v2 }
 0x220   : > { %6725 = vmatpush3.bf16.msra.mxu1 %v7933_v20  ;;  %5860 = vmatprep.mubr.f32.mxu1 %v9310_v55  ;;  %v8258_v55 = vand.u32 4294901760, %v2584_v17 }
 0x221   : > { %6727 = vmatprep.subr.bf16.mxu1 %v7951_v28 }
 0x223   : > { %5861 = vmatmul.mubr.f32.gmra.mrb[4].mxu1 %v9311_v22  ;;  %v2562_v22 = vld [vmem:[%s9204_s4 + $0x20] sm:$0xff] }
 0x224   : > { %6729 = vmatpush3.bf16.msra.mxu1 %v7951_v28  ;;  %5863 = vmatprep.mubr.f32.mxu1 %v9312_v34  ;;  %v8264_v34 = vsub.f32 %v2578_v27, %v8253_v50 }
 0x225   : > { %6731 = vmatprep.subr.bf16.mxu1 %v7970_v13 }
 0x227   : > { %5864 = vmatmul.mubr.f32.gmra.mrb[6].mxu1 %v1432_v4  ;;  %v2558_v4 = vld [vmem:[%s9204_s4] sm:$0xff] }
 0x228   : > { %6733 = vmatpush3.bf16.msra.mxu1 %v7970_v13  ;;  %5866 = vmatprep.mubr.f32.mxu1 %v1442_v39  ;;  %v2575_v39 = vsel %vm1238_vm0, %v2558_v4, 0 }
 0x229   : > { %6735 = vmatprep.subr.bf16.mxu1 %v7892_v33 }
 0x22b   : > { %5867 = vmatmul.mubr.f32.gmra.mrb[8].mxu1 %v1452_v7  ;;  %v8217_v7 = vand.u32 4294901760, %v2575_v39 }
 0x22c   : > { %5869 = vmatprep.mubr.f32.mxu1 %v9313_v58 }
 0x22f   : > { %5870 = vmatmul.mubr.f32.gmra.mrb[10].mxu1 %v1472_v23 }
 0x230   : > { %5872 = vmatprep.mubr.f32.mxu1 %v9314_v8  ;;  %v2563_v8 = vld [vmem:[%s9204_s4 + $0x28] sm:$0xff] }
 0x233   : > { %5873 = vmatmul.mubr.f32.gmra.mrb[12].mxu1 %v1492_v62 }
 0x234   : > { %5875 = vmatprep.mubr.f32.mxu1 %v1502_v42 }
 0x237   : > { %5876 = vmatmul.mubr.f32.gmra.mrb[14].mxu1 %v1512_v37  ;;  %v2560_v37 = vld [vmem:[%s9204_s4 + $0x10] sm:$0xff] }
 0x238   : > { %5894 = vmatprep.mubr.f32.mxu1 %v7809_v16  ;;  %v2581_v53 = vsel %vm1238_vm0, %v2560_v37, 0 }
 0x239   : > { %v8256_v2 = vand.u32 4294901760, %v2581_v53 }
 0x23b   : > { %5895 = vmatmul.mubr.f32.vlgmr.msra.gmra.mrb[0].mxu1 %v7830_v44  ;;  %v8267_v58 = vsub.f32 %v2581_v53, %v8256_v2 }
 0x23c   : > { %6737 = vmatpush3.bf16.msra.mxu1 %v7892_v33  ;;  %5897 = vmatprep.mubr.f32.mxu1 %v7832_v52 }
 0x23d   : > { %6739 = vmatprep.subr.bf16.mxu1 %v7911_v10 }
 0x23f   : > { %5898 = vmatmul.mubr.f32.gmra.mrb[2].mxu1 %v7834_v43 }
 0x240   : > { %6741 = vmatpush3.bf16.msra.mxu1 %v7911_v10  ;;  %5900 = vmatprep.mubr.f32.mxu1 %v7855_v9  ;;  %v260_v10 = vlaneseq }
 0x241   : > { %6743 = vmatprep.subr.bf16.mxu1 %v7928_v45 }
 0x242   : > { %v261_v1 = vand.u32 127, %v260_v10  ;;  %v2505_v10 = vld [vmem:[%s9203_s3 + $0x20] sm:$0xff] }
 0x243   : > { %5901 = vmatmul.mubr.f32.gmra.mrb[4].mxu1 %v7861_v56 }
 0x244   : > { %6745 = vmatpush3.bf16.msra.mxu1 %v7928_v45  ;;  %5903 = vmatprep.mubr.f32.mxu1 %v7890_v32  ;;  %vm262_vm1 = vcmp.lt.s32.totalorder %v261_v1, 64  ;;  %v4867_v1 = vld [vmem:[%s9203_s3 + $0x48] sm:$0xff] }
 0x245   : > { %6747 = vmatprep.subr.bf16.mxu1 %v7941_v21 }
 0x247   : > { %5904 = vmatmul.mubr.f32.gmra.mrb[6].mxu1 %v7900_v29 }
 0x248   : > { %6749 = vmatpush3.bf16.msra.mxu1 %v7941_v21  ;;  %5906 = vmatprep.mubr.f32.mxu1 %v7925_v48 }
 0x24b   : > { %5907 = vmatmul.mubr.f32.gmra.mrb[8].mxu1 %v7946_v61 }
 0x24c   : > { %5909 = vmatprep.mubr.f32.mxu1 %v7963_v31 }
 0x24f   : > { %5910 = vmatmul.mubr.f32.gmra.mrb[10].mxu1 %v7988_v24 }
 0x250   : > { %5912 = vmatprep.mubr.f32.mxu1 %v7995_v30 }
 0x253   : > { %5913 = vmatmul.mubr.f32.gmra.mrb[12].mxu1 %v8014_v0 }
 0x254   : > { %5915 = vmatprep.mubr.f32.mxu1 %v8020_v6 }
 0x257   : > { %5916 = vmatmul.mubr.f32.gmra.mrb[14].mxu1 %v8030_v18 }
 0x258   : > { %5934 = vmatprep.mubr.f32.mxu1 %v7809_v16 }
 0x25b   : > { %5935 = vmatmul.mubr.f32.vlgmr.msra.gmra.mrb[0].mxu1 %v7830_v44 }
 0x25c   : > { %5937 = vmatprep.mubr.f32.mxu1 %v7832_v52 }
 0x25f   : > { %5938 = vmatmul.mubr.f32.gmra.mrb[2].mxu1 %v7834_v43 }
 0x260   : > { %5940 = vmatprep.mubr.f32.mxu1 %v7855_v9 }
 0x263   : > { %5941 = vmatmul.mubr.f32.gmra.mrb[4].mxu1 %v7861_v56 }
 0x264   : > { %5943 = vmatprep.mubr.f32.mxu1 %v7890_v32 }
 0x267   : > { %5944 = vmatmul.mubr.f32.gmra.mrb[6].mxu1 %v7900_v29 }
 0x268   : > { %5946 = vmatprep.mubr.f32.mxu1 %v7925_v48  ;;  %v8196_v48 = vsel %vm262_vm1, -1.0, %v7297_v19  ;;  %v2506_v19 = vld [vmem:[%s9203_s3 + $0x28] sm:$0xff] }
 0x26b   : > { %5947 = vmatmul.mubr.f32.gmra.mrb[8].mxu1 %v7946_v61 }
 0x26c   : > { %5949 = vmatprep.mubr.f32.mxu1 %v7963_v31 }
 0x26f   : > { %5950 = vmatmul.mubr.f32.gmra.mrb[10].mxu1 %v7988_v24 }
 0x270   : > { %5952 = vmatprep.mubr.f32.mxu1 %v7995_v30 }
 0x273   : > { %5953 = vmatmul.mubr.f32.gmra.mrb[12].mxu1 %v8014_v0 }
 0x274   : > { %5955 = vmatprep.mubr.f32.mxu1 %v8020_v6  ;;  %v8223_v6 = vsub.f32 %v2575_v39, %v8217_v7 }
 0x276   : > { %v2697_v47 = vand.u32 4294901760, %v8223_v6 }
 0x277   : > { %5956 = vmatmul.mubr.f32.gmra.mrb[14].mxu1 %v8030_v18 }
 0x278   : > { %v2698_v15 = vsub.f32 %v8223_v6, %v2697_v47 }
 0x27a   : > { %v2699_v60 = vand.u32 4294901760, %v2698_v15 }
 0x27c   : > { %5974 = vmatprep.mubr.f32.mxu0 %v2699_v60 }
 0x32e   : > { %v5936_v16 = vpop.f32.mrb[0].mxu1 }
 0x32f   : > { %v2375_v44 = vpop.f32.mrb[1].mxu1 }
 0x332   : > { %v5939_v52 = vpop.f32.mrb[2].mxu1 }
 0x333   : > { %v2387_v43 = vpop.f32.mrb[3].mxu1 }
 0x336   : > { %v5942_v40 = vpop.f32.mrb[4].mxu1 }
 0x337   : > { %v2399_v54 = vpop.f32.mrb[5].mxu1 }
 0x33a   : > { %v5945_v5 = vpop.f32.mrb[6].mxu1 }
 0x33b   : > { %v2411_v9 = vpop.f32.mrb[7].mxu1 }
 0x33e   : > { %v5948_v56 = vpop.f32.mrb[8].mxu1 }
 0x33f   : > { %v2423_v46 = vpop.f32.mrb[9].mxu1 }
 0x340   : > { %2469 = vrot.lane.b32.xlu0 %v2423_v46, %s7296_s28  ;;  %v2502_v46 = vld [vmem:[%s9203_s3 + $0x8] sm:$0xff] }
 0x342   : > { %v5951_v63 = vpop.f32.mrb[10].mxu1 }
 0x343   : > { %2475 = vrot.lane.b32.xlu1 %v5951_v63, %s7296_s28  ;;  %v2435_v32 = vpop.f32.mrb[11].mxu1  ;;  %v2504_v63 = vld [vmem:[%s9203_s3 + $0x18] sm:$0xff] }
 0x344   : > { %2471 = vrot.lane.b32.xlu0 %v5948_v56, %s7296_s28 }
 0x346   : > { %v5954_v33 = vpop.f32.mrb[12].mxu1 }
 0x347   : > { %2473 = vrot.lane.b32.xlu1 %v2435_v32, %s7296_s28  ;;  %v2447_v29 = vpop.f32.mrb[13].mxu1  ;;  %v9249_v32 = vand.u32 4294901760, %v8267_v58 }
 0x348   : > { %2477 = vrot.lane.b32.xlu0 %v2447_v29, %s7296_s28 }
 0x34a   : > { %v5957_v30 = vpop.f32.mrb[14].mxu1 }
 0x34b   : > { %2479 = vrot.lane.b32.xlu1 %v5954_v33, %s7296_s28  ;;  %v2459_v49 = vpop.f32.mrb[15].mxu1 }
 0x34c   : > { %2481 = vrot.lane.b32.xlu0 %v2459_v49, %s7296_s28  ;;  %v2503_v49 = vld [vmem:[%s9203_s3 + $0x10] sm:$0xff] }
 0x34f   : > { %2483 = vrot.lane.b32.xlu1 %v5957_v30, %s7296_s28 }
 0x3b2   : > { %v2470_v45 = vpop.permute.xlu0 %2469 }
 0x3b3   : > { %v2485_v20 = vmul.f32 %v2470_v45, %v8196_v48 }
 0x3b5   : > { %v8199_v3 = vadd.f32 %v2485_v20, %v2375_v44  ;;  %v2476_v51 = vpop.permute.xlu1 %2475  ;;  %v2587_v44 = vsel %vm1238_vm0, %v2562_v22, 0 }
 0x3b6   : > { %v2472_v21 = vpop.permute.xlu0 %2471  ;;  %v2488_v28 = vmul.f32 %v2476_v51, %v8196_v48  ;;  %v8295_v33 = vand.u32 4294901760, %v2587_v44  ;;  %v2565_v51 = vld [vmem:[%s9204_s4 + $0x38] sm:$0xff] }
 0x3b7   : > { %v2486_v61 = vmul.f32 %v2472_v21, %v8196_v48  ;;  %2526 = vrot.lane.b32.xlu0 %v8199_v3, %s7296_s28 }
 0x3b8   : > { %v2496_v59 = vadd.f32 %v5939_v52, %v2488_v28  ;;  %v2501_v52 = vld [vmem:[%s9203_s3] sm:$0xff] }
 0x3b9   : > { %v8205_v35 = vadd.f32 %v5936_v16, %v2486_v61  ;;  %v2474_v57 = vpop.permute.xlu1 %2473  ;;  %v2564_v16 = vld [vmem:[%s9204_s4 + $0x30] sm:$0xff]  ;;  %v2509_v29 = vmul.f32 %v2501_v52, %v8199_v3 }
 0x3ba   : > { %v2487_v31 = vmul.f32 %v2474_v57, %v8196_v48  ;;  %v2478_v13 = vpop.permute.xlu0 %2477  ;;  %v2512_v28 = vmul.f32 %v2504_v63, %v2496_v59  ;;  %v2507_v57 = vld [vmem:[%s9203_s3 + $0x30] sm:$0xff] }
 0x3bb   : > { %2528 = vrot.lane.b32.xlu1 %v8205_v35, %s7296_s28  ;;  %v2489_v24 = vmul.f32 %v2478_v13, %v8196_v48  ;;  %v2510_v61 = vmul.f32 %v2502_v46, %v8205_v35  ;;  %v8334_v35 = vsub.f32 %v8267_v58, %v9249_v32 }
 0x3bc   : > { %v8214_v25 = vadd.f32 %v2487_v31, %v2387_v43  ;;  %v4866_v43 = vld [vmem:[%s9203_s3 + $0x40] sm:$0xff] }
 0x3bd   : > { %v2480_v0 = vpop.permute.xlu1 %2479  ;;  %v2497_v23 = vadd.f32 %v2489_v24, %v2399_v54  ;;  %v2707_v54 = vand.u32 4294901760, %v8264_v34  ;;  %v2508_v24 = vld [vmem:[%s9203_s3 + $0x38] sm:$0xff]  ;;  %v2719_v22 = vand.u32 4294901760, %v8334_v35 }
 0x3be   : > { %v2490_v42 = vmul.f32 %v2480_v0, %v8196_v48  ;;  %2530 = vrot.lane.b32.xlu0 %v8214_v25, %s7296_s28  ;;  %v2482_v12 = vpop.permute.xlu0 %2481  ;;  %v2511_v4 = vmul.f32 %v2503_v49, %v8214_v25 }
 0x3bf   : > { %2532 = vrot.lane.b32.xlu1 %v2496_v59, %s7296_s28  ;;  %v2491_v18 = vmul.f32 %v2482_v12, %v8196_v48  ;;  %v8325_v31 = vsub.f32 %v8264_v34, %v2707_v54  ;;  %v2513_v39 = vmul.f32 %v2505_v10, %v2497_v23  ;;  %v8337_v59 = vsub.f32 %v2587_v44, %v8295_v33  ;;  %v4868_v12 = vld [vmem:[%s9203_s3 + $0x50] sm:$0xff] }
 0x3c0   : > { %v8226_v14 = vadd.f32 %v5942_v40, %v2490_v42  ;;  %v8283_v40 = vsub.f32 %v2584_v17, %v8258_v55 }
 0x3c1   : > { %v2484_v26 = vpop.permute.xlu1 %2483  ;;  %v2499_v41 = vadd.f32 %v2491_v18, %v2411_v9  ;;  %v2593_v9 = vsel %vm1238_vm0, %v2564_v16, 0  ;;  %v4869_v18 = vld [vmem:[%s9203_s3 + $0x58] sm:$0xff]  ;;  %v2709_v11 = vand.u32 4294901760, %v8325_v31 }
 0x3c2   : > { %v2492_v62 = vmul.f32 %v2484_v26, %v8196_v48  ;;  %2534 = vrot.lane.b32.xlu0 %v2497_v23, %s7296_s28  ;;  %v9245_v45 = vand.u32 4294901760, %v8283_v40  ;;  %v8313_v3 = vand.u32 4294901760, %v2593_v9  ;;  %v2514_v25 = vmul.f32 %v2506_v19, %v8226_v14 }
 0x3c3   : > { %2536 = vrot.lane.b32.xlu1 %v8226_v14, %s7296_s28  ;;  %v2596_v23 = vsel %vm1238_vm0, %v2565_v51, 0  ;;  %v8347_v26 = vmul.f32 %v2507_v57, %v2499_v41  ;;  %v2566_v14 = vld [vmem:[%s9204_s4 + $0x40] sm:$0xff] }
 0x3c4   : > { %v8237_v38 = vadd.f32 %v5945_v5, %v2492_v62  ;;  %v2590_v5 = vsel %vm1238_vm0, %v2563_v8, 0  ;;  %v8352_v62 = vsub.f32 %v8283_v40, %v9245_v45  ;;  %v8358_v60 = vsub.f32 %v2593_v9, %v8313_v3 }
 0x3c5   : > { %v8311_v20 = vand.u32 4294901760, %v2590_v5  ;;  %v9246_v8 = vand.u32 4294901760, %v8337_v59  ;;  %v8367_v16 = vand.u32 4294901760, %v2596_v23  ;;  %v8373_v9 = vsel %vm1238_vm0, %v2566_v14, 0 }
 0x3c6   : > { %2538 = vrot.lane.b32.xlu0 %v2499_v41, %s7296_s28  ;;  %v2516_v41 = vmul.f32 %v2508_v24, %v8237_v38  ;;  %v2729_v46 = vand.u32 4294901760, %v8352_v62 }
 0x3c7   : > { %2540 = vrot.lane.b32.xlu1 %v8237_v38, %s7296_s28  ;;  %v8355_v15 = vsub.f32 %v2590_v5, %v8311_v20 }
 0x3c9   : > { %v9248_v63 = vand.u32 4294901760, %v8355_v15 }
 0x429   : > { %v2527_v56 = vpop.permute.xlu0 %2526 }
 0x42a   : > { %v2542_v30 = vmul.f32 %v4866_v43, %v2527_v56  ;;  %v4870_v43 = vld [vmem:[%s9203_s3 + $0x60] sm:$0xff]  ;;  %v4871_v56 = vld [vmem:[%s9203_s3 + $0x68] sm:$0xff] }
 0x42c   : > { %v2550_v21 = vadd.f32 %v2542_v30, %v2509_v29  ;;  %v9247_v29 = vand.u32 4294901760, %v8358_v60  ;;  %v2567_v30 = vld [vmem:[%s9204_s4 + $0x48] sm:$0xff] }
 0x42d   : > { %v2529_v13 = vpop.permute.xlu1 %2528 }
 0x42e   : > { %v2623_v0 = vand.u32 4294901760, %v2550_v21  ;;  %v2543_v42 = vmul.f32 %v4867_v1, %v2529_v13  ;;  %v8387_v13 = vsub.f32 %v2596_v23, %v8367_v16  ;;  %v4873_v23 = vld [vmem:[%s9203_s3 + $0x78] sm:$0xff] }
 0x430   : > { %v2857_v36 = vsub.f32 %v2550_v21, %v2623_v0  ;;  %v2551_v37 = vadd.f32 %v2543_v42, %v2510_v61  ;;  %v2531_v27 = vpop.permute.xlu0 %2530 }
 0x431   : > { %v2544_v53 = vmul.f32 %v4868_v12, %v2531_v27  ;;  %v2533_v17 = vpop.permute.xlu1 %2532  ;;  %v8397_v12 = vsel %vm1238_vm0, %v2567_v30, 0 }
 0x432   : > { %v2626_v44 = vand.u32 4294901760, %v2551_v37  ;;  %v2545_v52 = vmul.f32 %v4869_v18, %v2533_v17  ;;  %v2858_v5 = vand.u32 4294901760, %v2857_v36 }
 0x433   : > { %v2552_v38 = vadd.f32 %v2544_v53, %v2511_v4  ;;  %v8390_v4 = vand.u32 4294901760, %v8373_v9 }
 0x434   : > { %v8384_v49 = vpack.c.bf16 %v2626_v44, %v2623_v0  ;;  %v2864_v10 = vsub.f32 %v2551_v37, %v2626_v44  ;;  %v2553_v1 = vadd.f32 %v2545_v52, %v2512_v28  ;;  %v2535_v19 = vpop.permute.xlu0 %2534  ;;  %v2859_v51 = vsub.f32 %v2857_v36, %v2858_v5  ;;  %v4872_v0 = vld [vmem:[%s9203_s3 + $0x70] sm:$0xff] }
 0x435   : > { %v2629_v21 = vand.u32 4294901760, %v2552_v38  ;;  %v2546_v61 = vmul.f32 %v4870_v43, %v2535_v19  ;;  %v2537_v57 = vpop.permute.xlu1 %2536 }
 0x436   : > { %v2632_v24 = vand.u32 4294901760, %v2553_v1  ;;  %v2547_v42 = vmul.f32 %v4871_v56, %v2537_v57  ;;  %6751 = vmatprep.subr.bf16.mxu0 %v8384_v49  ;;  %v2865_v28 = vand.u32 4294901760, %v2864_v10  ;;  %v2860_v37 = vand.u32 4294901760, %v2859_v51 }
 0x437   : > { %v2871_v18 = vsub.f32 %v2552_v38, %v2629_v21  ;;  %v2554_v14 = vadd.f32 %v2546_v61, %v2513_v39  ;;  %6753 = vmatpush3.bf16.msra.mxu0 %v8384_v49  ;;  %v8403_v27 = vpack.c.bf16 %v2864_v10, %v2857_v36 }
 0x438   : > { %v8405_v53 = vpack.c.bf16 %v2632_v24, %v2629_v21  ;;  %v2878_v17 = vsub.f32 %v2553_v1, %v2632_v24  ;;  %v2555_v44 = vadd.f32 %v2547_v42, %v2514_v25  ;;  %v2539_v52 = vpop.permute.xlu0 %2538  ;;  %v2866_v43 = vsub.f32 %v2864_v10, %v2865_v28 }
 0x439   : > { %v2635_v56 = vand.u32 4294901760, %v2554_v14  ;;  %v2548_v30 = vmul.f32 %v4872_v0, %v2539_v52  ;;  %v2541_v19 = vpop.permute.xlu1 %2540  ;;  %v2872_v38 = vand.u32 4294901760, %v2871_v18  ;;  %v8407_v39 = vpack.c.bf16 %v2865_v28, %v2858_v5  ;;  %v2568_v0 = vld [vmem:[%s9204_s4 + $0x50] sm:$0xff] }
 0x43a   : > { %v2638_v61 = vand.u32 4294901760, %v2555_v44  ;;  %v2549_v57 = vmul.f32 %v4873_v23, %v2541_v19  ;;  %6755 = vmatprep.subr.bf16.mxu0 %v8405_v53  ;;  %v2867_v45 = vand.u32 4294901760, %v2866_v43  ;;  %v2879_v51 = vand.u32 4294901760, %v2878_v17 }
 0x43b   : > { %v2885_v36 = vsub.f32 %v2554_v14, %v2635_v56  ;;  %v2556_v21 = vadd.f32 %v2548_v30, %v8347_v26  ;;  %6757 = vmatpush3.bf16.msra.mxu0 %v8405_v53  ;;  %v2873_v25 = vsub.f32 %v2871_v18, %v2872_v38  ;;  %v8412_v1 = vpack.c.bf16 %v2878_v17, %v2871_v18 }
 0x43c   : > { %v8414_v10 = vpack.c.bf16 %v2638_v61, %v2635_v56  ;;  %v2892_v24 = vsub.f32 %v2555_v44, %v2638_v61  ;;  %v2557_v42 = vadd.f32 %v2549_v57, %v2516_v41  ;;  %v6766_v5 = vpack.c.bf16 %v2867_v45, %v2860_v37  ;;  %v2569_v61 = vld [vmem:[%s9204_s4 + $0x58] sm:$0xff] }
 0x43d   : > { %v2641_v28 = vand.u32 4294901760, %v2556_v21  ;;  %v2874_v23 = vand.u32 4294901760, %v2873_v25  ;;  %v2880_v52 = vsub.f32 %v2878_v17, %v2879_v51  ;;  %v2886_v14 = vand.u32 4294901760, %v2885_v36 }
 0x43e   : > { %v2644_v43 = vand.u32 4294901760, %v2557_v42  ;;  %6759 = vmatprep.subr.bf16.mxu0 %v8414_v10  ;;  %v2893_v26 = vand.u32 4294901760, %v2892_v24  ;;  %v8420_v30 = vpack.c.bf16 %v2892_v24, %v2885_v36  ;;  %v8422_v18 = vpack.c.bf16 %v2879_v51, %v2872_v38 }
 0x43f   : > { %v2899_v56 = vsub.f32 %v2556_v21, %v2641_v28  ;;  %6761 = vmatpush3.bf16.msra.mxu0 %v8414_v10  ;;  %v2881_v45 = vand.u32 4294901760, %v2880_v52  ;;  %v2887_v41 = vsub.f32 %v2885_v36, %v2886_v14  ;;  %v2605_v37 = vsel %vm1238_vm0, %v2568_v0, 0  ;;  %v2570_v36 = vld [vmem:[%s9204_s4 + $0x60] sm:$0xff] }
 0x440   : > { %v8426_v44 = vpack.c.bf16 %v2644_v43, %v2641_v28  ;;  %v2906_v19 = vsub.f32 %v2557_v42, %v2644_v43  ;;  %v2894_v17 = vsub.f32 %v2892_v24, %v2893_v26  ;;  %v8431_v57 = vpack.c.bf16 %v2893_v26, %v2886_v14 }
 0x441   : > { %v6770_v25 = vpack.c.bf16 %v2881_v45, %v2874_v23  ;;  %v2888_v38 = vand.u32 4294901760, %v2887_v41  ;;  %v2900_v51 = vand.u32 4294901760, %v2899_v56  ;;  %v8434_v21 = vand.u32 4294901760, %v8397_v12 }
 0x442   : > { %6763 = vmatprep.subr.bf16.mxu0 %v8426_v44  ;;  %v2895_v42 = vand.u32 4294901760, %v2894_v17  ;;  %v2907_v24 = vand.u32 4294901760, %v2906_v19  ;;  %v8442_v0 = vsub.f32 %v8373_v9, %v8390_v4  ;;  %v8444_v28 = vpack.c.bf16 %v2906_v19, %v2899_v56  ;;  %v2571_v9 = vld [vmem:[%s9204_s4 + $0x68] sm:$0xff] }
 0x443   : > { %6765 = vmatpush3.bf16.msra.mxu0 %v8426_v44  ;;  %v2738_v23 = vsub.f32 %v8337_v59, %v9246_v8  ;;  %v2901_v52 = vsub.f32 %v2899_v56, %v2900_v51  ;;  %v8450_v14 = vand.u32 4294901760, %v2605_v37  ;;  %v2608_v43 = vsel %vm1238_vm0, %v2569_v61, 0 }
 0x444   : > { %6767 = vmatprep.subr.bf16.mxu0 %v6766_v5  ;;  %v6774_v26 = vpack.c.bf16 %v2895_v42, %v2888_v38  ;;  %v2908_v45 = vsub.f32 %v2906_v19, %v2907_v24  ;;  %v2611_v41 = vsel %vm1238_vm0, %v2570_v36, 0  ;;  %v8457_v17 = vpack.c.bf16 %v2907_v24, %v2900_v51  ;;  %v2572_v19 = vld [vmem:[%s9204_s4 + $0x70] sm:$0xff] }
 0x445   : > { %v2748_v8 = vsub.f32 %v8355_v15, %v9248_v63  ;;  %v2902_v56 = vand.u32 4294901760, %v2901_v52  ;;  %v2758_v61 = vsub.f32 %v8358_v60, %v9247_v29  ;;  %v2767_v38 = vand.u32 4294901760, %v8387_v13 }
 0x446   : > { %5975 = vmatmul.mubr.f32.vlgmr.msra.gmra.mrb[8].mxu0 %v2709_v11  ;;  %v2909_v51 = vand.u32 4294901760, %v2908_v45  ;;  %v2777_v36 = vand.u32 4294901760, %v8442_v0  ;;  %v8474_v42 = vsub.f32 %v8397_v12, %v8434_v21  ;;  %v8476_v24 = vand.u32 4294901760, %v2608_v43  ;;  %v2573_v12 = vld [vmem:[%s9204_s4 + $0x78] sm:$0xff] }
 0x447   : > { %6769 = vmatpush3.bf16.msra.mxu0 %v6766_v5  ;;  %5977 = vmatprep.mubr.f32.mxu0 %v2719_v22  ;;  %v2739_v52 = vand.u32 4294901760, %v2738_v23  ;;  %v8481_v29 = vsub.f32 %v2605_v37, %v8450_v14  ;;  %v8483_v63 = vand.u32 4294901760, %v2611_v41  ;;  %v2614_v31 = vsel %vm1238_vm0, %v2571_v9, 0 }
 0x448   : > { %6771 = vmatprep.subr.bf16.mxu0 %v6770_v25  ;;  %v6778_v11 = vpack.c.bf16 %v2909_v51, %v2902_v56  ;;  %v2617_v45 = vsel %vm1238_vm0, %v2572_v19, 0  ;;  %v2749_v5 = vand.u32 4294901760, %v2748_v8  ;;  %v2759_v32 = vand.u32 4294901760, %v2758_v61 }
 0x449   : > { %v2768_v35 = vsub.f32 %v8387_v13, %v2767_v38  ;;  %v2778_v22 = vsub.f32 %v8442_v0, %v2777_v36  ;;  %v2787_v37 = vand.u32 4294901760, %v8474_v42  ;;  %v8500_v23 = vsub.f32 %v2608_v43, %v8476_v24 }
 0x44a   : > { %5978 = vmatmul.mubr.f32.gmra.mrb[10].mxu0 %v2729_v46  ;;  %v8502_v9 = vand.u32 4294901760, %v2614_v31  ;;  %v9250_v8 = vand.u32 4294901760, %v8481_v29  ;;  %v8506_v56 = vsub.f32 %v2611_v41, %v8483_v63  ;;  %v8508_v62 = vand.u32 4294901760, %v2617_v45 }
 0x44b   : > { %6773 = vmatpush3.bf16.msra.mxu0 %v6770_v25  ;;  %5980 = vmatprep.mubr.f32.mxu0 %v2739_v52  ;;  %v2620_v46 = vsel %vm1238_vm0, %v2573_v12, 0  ;;  %v2769_v61 = vand.u32 4294901760, %v2768_v35  ;;  %v2788_v43 = vsub.f32 %v8474_v42, %v2787_v37  ;;  %v2807_v19 = vand.u32 4294901760, %v8500_v23 }
 0x44c   : > { %6775 = vmatprep.subr.bf16.mxu0 %v6774_v26  ;;  %v8516_v25 = vsub.f32 %v2614_v31, %v8502_v9  ;;  %v8518_v51 = vand.u32 4294901760, %v2620_v46  ;;  %v2779_v41 = vand.u32 4294901760, %v2778_v22  ;;  %v2798_v52 = vsub.f32 %v8481_v29, %v9250_v8 }
 0x44d   : > { %v9251_v12 = vand.u32 4294901760, %v8506_v56  ;;  %v2789_v35 = vand.u32 4294901760, %v2788_v43  ;;  %v2808_v31 = vsub.f32 %v8500_v23, %v2807_v19 }
 0x44e   : > { %5981 = vmatmul.mubr.f32.gmra.mrb[12].mxu0 %v2749_v5  ;;  %v8525_v5 = vsub.f32 %v2617_v45, %v8508_v62  ;;  %v2799_v22 = vand.u32 4294901760, %v2798_v52 }
 0x44f   : > { %6777 = vmatpush3.bf16.msra.mxu0 %v6774_v26  ;;  %5983 = vmatprep.mubr.f32.mxu0 %v2759_v32  ;;  %v2827_v26 = vand.u32 4294901760, %v8516_v25  ;;  %v8532_v32 = vsub.f32 %v2620_v46, %v8518_v51  ;;  %v2818_v45 = vsub.f32 %v8506_v56, %v9251_v12 }
 0x450   : > { %6779 = vmatprep.subr.bf16.mxu0 %v6778_v11  ;;  %v2837_v8 = vand.u32 4294901760, %v8525_v5 }
 0x451   : > { %v2828_v43 = vsub.f32 %v8516_v25, %v2827_v26  ;;  %v2847_v46 = vand.u32 4294901760, %v8532_v32 }
 0x452   : > { %5984 = vmatmul.mubr.f32.gmra.mrb[14].mxu0 %v2769_v61  ;;  %v2809_v61 = vand.u32 4294901760, %v2808_v31 }
 0x453   : > { %6781 = vmatpush3.bf16.msra.mxu0 %v6778_v11  ;;  %5986 = vmatprep.mubr.f32.mxu0 %v2779_v41  ;;  %v2819_v11 = vand.u32 4294901760, %v2818_v45  ;;  %v2838_v41 = vsub.f32 %v8525_v5, %v2837_v8  ;;  %v2829_v52 = vand.u32 4294901760, %v2828_v43  ;;  %v2848_v12 = vsub.f32 %v8532_v32, %v2847_v46 }
 0x454   : > { %6783 = vmatprep.subr.bf16.mxu0 %v8403_v27 }
 0x455   : > { %v2849_v31 = vand.u32 4294901760, %v2848_v12 }
 0x456   : > { %5987 = vmatmul.mubr.f32.gmra.mrb[16].mxu0 %v2789_v35  ;;  %v2839_v35 = vand.u32 4294901760, %v2838_v41 }
 0x457   : > { %5989 = vmatprep.mubr.f32.mxu0 %v2799_v22 }
 0x45a   : > { %5990 = vmatmul.mubr.f32.gmra.mrb[18].mxu0 %v2809_v61 }
 0x45b   : > { %5992 = vmatprep.mubr.f32.mxu0 %v2819_v11 }
 0x45e   : > { %5993 = vmatmul.mubr.f32.gmra.mrb[20].mxu0 %v2829_v52 }
 0x45f   : > { %5995 = vmatprep.mubr.f32.mxu0 %v2839_v35 }
 0x462   : > { %5996 = vmatmul.mubr.f32.gmra.mrb[22].mxu0 %v2849_v31 }
 0x463   : > { %6014 = vmatprep.mubr.f32.mxu0 %v8217_v7 }
 0x466   : > { %6015 = vmatmul.mubr.f32.vlgmr.msra.gmra.mrb[8].mxu0 %v8253_v50 }
 0x467   : > { %6785 = vmatpush3.bf16.msra.mxu0 %v8403_v27  ;;  %6017 = vmatprep.mubr.f32.mxu0 %v8256_v2  ;;  %v9315_v27 = vand.u32 4294901760, %v8267_v58 }
 0x468   : > { %6787 = vmatprep.subr.bf16.mxu0 %v8412_v1 }
 0x46a   : > { %6018 = vmatmul.mubr.f32.gmra.mrb[10].mxu0 %v8258_v55 }
 0x46b   : > { %6789 = vmatpush3.bf16.msra.mxu0 %v8412_v1  ;;  %6020 = vmatprep.mubr.f32.mxu0 %v8295_v33  ;;  %v9316_v1 = vand.u32 4294901760, %v8283_v40 }
 0x46c   : > { %6791 = vmatprep.subr.bf16.mxu0 %v8420_v30 }
 0x46e   : > { %6021 = vmatmul.mubr.f32.gmra.mrb[12].mxu0 %v8311_v20 }
 0x46f   : > { %6793 = vmatpush3.bf16.msra.mxu0 %v8420_v30  ;;  %6023 = vmatprep.mubr.f32.mxu0 %v8313_v3  ;;  %v9317_v30 = vand.u32 4294901760, %v8337_v59 }
 0x470   : > { %6795 = vmatprep.subr.bf16.mxu0 %v8444_v28 }
 0x472   : > { %6024 = vmatmul.mubr.f32.gmra.mrb[14].mxu0 %v8367_v16 }
 0x473   : > { %6797 = vmatpush3.bf16.msra.mxu0 %v8444_v28  ;;  %6026 = vmatprep.mubr.f32.mxu0 %v8390_v4 }
 0x474   : > { %6799 = vmatprep.subr.bf16.mxu0 %v8384_v49 }
 0x476   : > { %6027 = vmatmul.mubr.f32.gmra.mrb[16].mxu0 %v8434_v21 }
 0x477   : > { %6029 = vmatprep.mubr.f32.mxu0 %v8450_v14 }
 0x47a   : > { %6030 = vmatmul.mubr.f32.gmra.mrb[18].mxu0 %v8476_v24 }
 0x47b   : > { %6032 = vmatprep.mubr.f32.mxu0 %v8483_v63 }
 0x47e   : > { %6033 = vmatmul.mubr.f32.gmra.mrb[20].mxu0 %v8502_v9 }
 0x47f   : > { %6035 = vmatprep.mubr.f32.mxu0 %v8508_v62 }
 0x482   : > { %6036 = vmatmul.mubr.f32.gmra.mrb[22].mxu0 %v8518_v51 }
 0x483   : > { %6054 = vmatprep.mubr.f32.mxu0 %v8223_v6  ;;  %v9318_v6 = vand.u32 4294901760, %v8355_v15 }
 0x486   : > { %6055 = vmatmul.mubr.f32.vlgmr.msra.gmra.mrb[8].mxu0 %v8264_v34  ;;  %v9320_v34 = vand.u32 4294901760, %v8481_v29 }
 0x487   : > { %6801 = vmatpush3.bf16.msra.mxu0 %v8384_v49  ;;  %6057 = vmatprep.mubr.f32.mxu0 %v8267_v58  ;;  %v9321_v58 = vand.u32 4294901760, %v8506_v56 }
 0x488   : > { %6803 = vmatprep.subr.bf16.mxu0 %v8405_v53 }
 0x48a   : > { %6058 = vmatmul.mubr.f32.gmra.mrb[10].mxu0 %v8283_v40 }
 0x48b   : > { %6805 = vmatpush3.bf16.msra.mxu0 %v8405_v53  ;;  %6060 = vmatprep.mubr.f32.mxu0 %v8337_v59 }
 0x48c   : > { %6807 = vmatprep.subr.bf16.mxu0 %v8414_v10 }
 0x48e   : > { %6061 = vmatmul.mubr.f32.gmra.mrb[12].mxu0 %v8355_v15 }
 0x48f   : > { %6809 = vmatpush3.bf16.msra.mxu0 %v8414_v10  ;;  %6063 = vmatprep.mubr.f32.mxu0 %v8358_v60 }
 0x490   : > { %6811 = vmatprep.subr.bf16.mxu0 %v8426_v44 }
 0x492   : > { %6064 = vmatmul.mubr.f32.gmra.mrb[14].mxu0 %v8387_v13 }
 0x493   : > { %6813 = vmatpush3.bf16.msra.mxu0 %v8426_v44  ;;  %6066 = vmatprep.mubr.f32.mxu0 %v8442_v0 }
 0x494   : > { %6815 = vmatprep.subr.bf16.mxu0 %v8407_v39 }
 0x496   : > { %6067 = vmatmul.mubr.f32.gmra.mrb[16].mxu0 %v8474_v42 }
 0x497   : > { %6069 = vmatprep.mubr.f32.mxu0 %v8481_v29  ;;  %v8717_v29 = vld [vmem:[%s9205_s5 + $0x30] sm:$0xff] }
 0x49a   : > { %6070 = vmatmul.mubr.f32.gmra.mrb[18].mxu0 %v8500_v23 }
 0x49b   : > { %6072 = vmatprep.mubr.f32.mxu0 %v8506_v56 }
 0x49e   : > { %6073 = vmatmul.mubr.f32.gmra.mrb[20].mxu0 %v8516_v25 }
 0x49f   : > { %6075 = vmatprep.mubr.f32.mxu0 %v8525_v5 }
 0x4a2   : > { %6076 = vmatmul.mubr.f32.gmra.mrb[22].mxu0 %v8532_v32  ;;  %v3851_v32 = vld [vmem:[%s9205_s5 + $0x78] sm:$0xff] }
 0x4a3   : > { %6094 = vmatprep.mubr.f32.mxu0 %v2697_v47  ;;  %v9319_v47 = vand.u32 4294901760, %v8358_v60  ;;  %v3898_v61 = vand.u32 4294901760, %v3851_v32 }
 0x4a6   : > { %6095 = vmatmul.mubr.f32.vlgmr.msra.gmra.mrb[8].mxu0 %v2707_v54  ;;  %v8690_v54 = vld [vmem:[%s9205_s5 + $0x18] sm:$0xff] }
 0x4a7   : > { %6817 = vmatpush3.bf16.msra.mxu0 %v8407_v39  ;;  %6097 = vmatprep.mubr.f32.mxu0 %v9315_v27  ;;  %v3862_v59 = vand.u32 4294901760, %v8690_v54  ;;  %v8738_v39 = vld [vmem:[%s9205_s5 + $0x40] sm:$0xff] }
 0x4a8   : > { %6819 = vmatprep.subr.bf16.mxu0 %v8422_v18 }
 0x4aa   : > { %6098 = vmatmul.mubr.f32.gmra.mrb[10].mxu0 %v9316_v1 }
 0x4ab   : > { %6821 = vmatpush3.bf16.msra.mxu0 %v8422_v18  ;;  %6100 = vmatprep.mubr.f32.mxu0 %v9317_v30 }
 0x4ac   : > { %6823 = vmatprep.subr.bf16.mxu0 %v8431_v57 }
 0x4ae   : > { %6101 = vmatmul.mubr.f32.gmra.mrb[12].mxu0 %v9318_v6 }
 0x4af   : > { %6825 = vmatpush3.bf16.msra.mxu0 %v8431_v57  ;;  %6103 = vmatprep.mubr.f32.mxu0 %v9319_v47 }
 0x4b0   : > { %6827 = vmatprep.subr.bf16.mxu0 %v8457_v17 }
 0x4b2   : > { %6104 = vmatmul.mubr.f32.gmra.mrb[14].mxu0 %v2767_v38  ;;  %v3847_v38 = vld [vmem:[%s9205_s5 + $0x58] sm:$0xff] }
 0x4b3   : > { %6829 = vmatpush3.bf16.msra.mxu0 %v8457_v17  ;;  %6106 = vmatprep.mubr.f32.mxu0 %v2777_v36  ;;  %v3846_v17 = vld [vmem:[%s9205_s5 + $0x50] sm:$0xff] }
 0x4b4   : > { %6831 = vmatprep.subr.bf16.mxu0 %v8384_v49  ;;  %v3883_v42 = vand.u32 4294901760, %v3846_v17 }
 0x4b6   : > { %6107 = vmatmul.mubr.f32.gmra.mrb[16].mxu0 %v2787_v37 }
 0x4b7   : > { %6109 = vmatprep.mubr.f32.mxu0 %v9320_v34 }
 0x4ba   : > { %6110 = vmatmul.mubr.f32.gmra.mrb[18].mxu0 %v2807_v19 }
 0x4bb   : > { %6112 = vmatprep.mubr.f32.mxu0 %v9321_v58 }
 0x4be   : > { %6113 = vmatmul.mubr.f32.gmra.mrb[20].mxu0 %v2827_v26  ;;  %v3850_v26 = vld [vmem:[%s9205_s5 + $0x70] sm:$0xff] }
 0x4bf   : > { %6115 = vmatprep.mubr.f32.mxu0 %v2837_v8  ;;  %v3849_v8 = vld [vmem:[%s9205_s5 + $0x68] sm:$0xff]  ;;  %v3895_v45 = vand.u32 4294901760, %v3850_v26 }
 0x4c0   : > { %v3892_v19 = vand.u32 4294901760, %v3849_v8 }
 0x4c1   : > { %v8814_v11 = vpack.c.bf16 %v3898_v61, %v3895_v45 }
 0x4c2   : > { %6116 = vmatmul.mubr.f32.gmra.mrb[22].mxu0 %v2847_v46 }
 0x4c3   : > { %6134 = vmatprep.mubr.f32.mxu0 %v8217_v7 }
 0x4c6   : > { %6135 = vmatmul.mubr.f32.vlgmr.msra.gmra.mrb[8].mxu0 %v8253_v50 }
 0x4c7   : > { %6833 = vmatpush3.bf16.msra.mxu0 %v8384_v49  ;;  %6137 = vmatprep.mubr.f32.mxu0 %v8256_v2  ;;  %v8722_v49 = vld [vmem:[%s9205_s5 + $0x38] sm:$0xff] }
 0x4c8   : > { %6835 = vmatprep.subr.bf16.mxu0 %v8405_v53 }
 0x4ca   : > { %6138 = vmatmul.mubr.f32.gmra.mrb[10].mxu0 %v8258_v55 }
 0x4cb   : > { %6837 = vmatpush3.bf16.msra.mxu0 %v8405_v53  ;;  %6140 = vmatprep.mubr.f32.mxu0 %v8295_v33  ;;  %v3874_v53 = vand.u32 4294901760, %v8722_v49 }
 0x4cc   : > { %6839 = vmatprep.subr.bf16.mxu0 %v8414_v10 }
 0x4ce   : > { %6141 = vmatmul.mubr.f32.gmra.mrb[12].mxu0 %v8311_v20 }
 0x4cf   : > { %6841 = vmatpush3.bf16.msra.mxu0 %v8414_v10  ;;  %6143 = vmatprep.mubr.f32.mxu0 %v8313_v3  ;;  %v8743_v10 = vld [vmem:[%s9205_s5 + $0x48] sm:$0xff] }
 0x4d0   : > { %6843 = vmatprep.subr.bf16.mxu0 %v8426_v44  ;;  %v3880_v57 = vand.u32 4294901760, %v8743_v10 }
 0x4d2   : > { %6144 = vmatmul.mubr.f32.gmra.mrb[14].mxu0 %v8367_v16 }
 0x4d3   : > { %6845 = vmatpush3.bf16.msra.mxu0 %v8426_v44  ;;  %6146 = vmatprep.mubr.f32.mxu0 %v8390_v4  ;;  %v3877_v44 = vand.u32 4294901760, %v8738_v39 }
 0x4d6   : > { %6147 = vmatmul.mubr.f32.gmra.mrb[16].mxu0 %v8434_v21 }
 0x4d7   : > { %6149 = vmatprep.mubr.f32.mxu0 %v8450_v14 }
 0x4da   : > { %6150 = vmatmul.mubr.f32.gmra.mrb[18].mxu0 %v8476_v24 }
 0x4db   : > { %6152 = vmatprep.mubr.f32.mxu0 %v8483_v63 }
 0x4de   : > { %6153 = vmatmul.mubr.f32.gmra.mrb[20].mxu0 %v8502_v9 }
 0x4df   : > { %6155 = vmatprep.mubr.f32.mxu0 %v8508_v62 }
 0x4e2   : > { %6156 = vmatmul.mubr.f32.gmra.mrb[22].mxu0 %v8518_v51 }
 0x4e3   : > { %6174 = vmatprep.mubr.f32.mxu0 %v8217_v7  ;;  %v3836_v7 = vld [vmem:[%s9205_s5] sm:$0xff] }
 0x4e6   : > { %6175 = vmatmul.mubr.f32.vlgmr.msra.gmra.mrb[8].mxu0 %v8253_v50  ;;  %v3837_v50 = vld [vmem:[%s9205_s5 + $0x8] sm:$0xff] }
 0x4e7   : > { %6177 = vmatprep.mubr.f32.mxu0 %v8256_v2  ;;  %v8685_v2 = vld [vmem:[%s9205_s5 + $0x10] sm:$0xff]  ;;  %v3856_v40 = vand.u32 4294901760, %v3837_v50 }
 0x4e9   : > { %v8798_v12 = vsub.f32 %v3837_v50, %v3856_v40 }
 0x4ea   : > { %6178 = vmatmul.mubr.f32.gmra.mrb[10].mxu0 %v8258_v55  ;;  %v3853_v55 = vand.u32 4294901760, %v3836_v7 }
 0x4eb   : > { %6180 = vmatprep.mubr.f32.mxu0 %v8295_v33  ;;  %v3859_v33 = vand.u32 4294901760, %v8685_v2  ;;  %v9264_v46 = vand.u32 4294901760, %v8798_v12 }
 0x4ec   : > { %v8704_v15 = vpack.c.bf16 %v3856_v40, %v3853_v55 }
 0x4ed   : > { %v4024_v52 = vsub.f32 %v8798_v12, %v9264_v46 }
 0x4ee   : > { %6181 = vmatmul.mubr.f32.gmra.mrb[12].mxu0 %v8311_v20  ;;  %v8696_v20 = vld [vmem:[%s9205_s5 + $0x20] sm:$0xff]  ;;  %6847 = vmatprep.subr.bf16.mxu1 %v8704_v15 }
 0x4ef   : > { %6183 = vmatprep.mubr.f32.mxu0 %v8313_v3  ;;  %v8701_v3 = vld [vmem:[%s9205_s5 + $0x28] sm:$0xff]  ;;  %v3865_v60 = vand.u32 4294901760, %v8696_v20  ;;  %6849 = vmatpush3.bf16.msra.mxu1 %v8704_v15  ;;  %v4025_v1 = vand.u32 4294901760, %v4024_v52 }
 0x4f2   : > { %6184 = vmatmul.mubr.f32.gmra.mrb[14].mxu0 %v8367_v16  ;;  %v3868_v16 = vand.u32 4294901760, %v8701_v3 }
 0x4f3   : > { %6186 = vmatprep.mubr.f32.mxu0 %v8390_v4  ;;  %v3871_v4 = vand.u32 4294901760, %v8717_v29 }
 0x4f4   : > { %v8731_v13 = vpack.c.bf16 %v3868_v16, %v3865_v60 }
 0x4f5   : > { %v8751_v18 = vpack.c.bf16 %v3874_v53, %v3871_v4 }
 0x4f6   : > { %6187 = vmatmul.mubr.f32.gmra.mrb[16].mxu0 %v8434_v21  ;;  %v8761_v21 = vpack.c.bf16 %v3880_v57, %v3877_v44 }
 0x4f7   : > { %6189 = vmatprep.mubr.f32.mxu0 %v8450_v14 }
 0x4fa   : > { %6190 = vmatmul.mubr.f32.gmra.mrb[18].mxu0 %v8476_v24  ;;  %v3886_v24 = vand.u32 4294901760, %v3847_v38 }
 0x4fb   : > { %6192 = vmatprep.mubr.f32.mxu0 %v8483_v63  ;;  %v8712_v63 = vpack.c.bf16 %v3862_v59, %v3859_v33 }
 0x4fc   : > { %v8780_v37 = vpack.c.bf16 %v3886_v24, %v3883_v42  ;;  %v8837_v40 = vsub.f32 %v3847_v38, %v3886_v24 }
 0x4fd   : > { %6851 = vmatprep.subr.bf16.mxu1 %v8712_v63 }
 0x4fe   : > { %6193 = vmatmul.mubr.f32.gmra.mrb[20].mxu0 %v8502_v9  ;;  %6853 = vmatpush3.bf16.msra.mxu1 %v8712_v63  ;;  %v3848_v9 = vld [vmem:[%s9205_s5 + $0x60] sm:$0xff]  ;;  %v9256_v52 = vand.u32 4294901760, %v8837_v40 }
 0x4ff   : > { %6195 = vmatprep.mubr.f32.mxu0 %v8508_v62  ;;  %6855 = vmatprep.subr.bf16.mxu1 %v8731_v13  ;;  %v3889_v62 = vand.u32 4294901760, %v3848_v9 }
 0x501   : > { %v8794_v25 = vpack.c.bf16 %v3892_v19, %v3889_v62 }
 0x502   : > { %6196 = vmatmul.mubr.f32.gmra.mrb[22].mxu0 %v8518_v51  ;;  %6857 = vmatpush3.bf16.msra.mxu1 %v8731_v13  ;;  %v8796_v51 = vsub.f32 %v3836_v7, %v3853_v55  ;;  %v8835_v55 = vsub.f32 %v3846_v17, %v3883_v42 }
 0x503   : > { %6859 = vmatprep.subr.bf16.mxu1 %v8751_v18 }
 0x504   : > { %v9266_v43 = vand.u32 4294901760, %v8796_v51 }
 0x506   : > { %6861 = vmatpush3.bf16.msra.mxu1 %v8751_v18  ;;  %v4017_v41 = vsub.f32 %v8796_v51, %v9266_v43 }
 0x507   : > { %6863 = vmatprep.subr.bf16.mxu1 %v8761_v21 }
 0x508   : > { %v4018_v27 = vand.u32 4294901760, %v4017_v41  ;;  %v9257_v41 = vand.u32 4294901760, %v8835_v55 }
 0x50a   : > { %6865 = vmatpush3.bf16.msra.mxu1 %v8761_v21  ;;  %v8826_v30 = vpack.c.bf16 %v4025_v1, %v4018_v27  ;;  %v8847_v27 = vsub.f32 %v3848_v9, %v3889_v62  ;;  %v8849_v1 = vsub.f32 %v3849_v8, %v3892_v19  ;;  %v8861_v9 = vsub.f32 %v3850_v26, %v3895_v45 }
 0x50b   : > { %6867 = vmatprep.subr.bf16.mxu1 %v8780_v37  ;;  %v8863_v8 = vsub.f32 %v3851_v32, %v3898_v61  ;;  %v8879_v61 = vpack.c.bf16 %v8798_v12, %v8796_v51 }
 0x50c   : > { %v9255_v38 = vand.u32 4294901760, %v8847_v27  ;;  %v9254_v24 = vand.u32 4294901760, %v8849_v1  ;;  %9322 = vst [vmem:[#allocation8_spill] sm:$0xff] %v8861_v9 }
 0x50d   : > { %9323 = vst [vmem:[#allocation2_spill] sm:$0xff] %v8863_v8 }
 0x50e   : > { %6869 = vmatpush3.bf16.msra.mxu1 %v8780_v37 }
 0x50f   : > { %6871 = vmatprep.subr.bf16.mxu1 %v8794_v25 }
 0x512   : > { %6873 = vmatpush3.bf16.msra.mxu1 %v8794_v25 }
 0x513   : > { %6875 = vmatprep.subr.bf16.mxu1 %v8814_v11 }
 0x516   : > { %6877 = vmatpush3.bf16.msra.mxu1 %v8814_v11 }
 0x517   : > { %6879 = vmatprep.subr.bf16.mxu1 %v8826_v30 }
 0x5b9   : > { %v8766_v0 = vpop.f32.mrb[8].mxu0 }
 0x5ba   : > { %v8768_v28 = vpop.f32.mrb[9].mxu0 }
 0x5bd   : > { %v8770_v14 = vpop.f32.mrb[10].mxu0 }
 0x5be   : > { %v8778_v36 = vpop.f32.mrb[11].mxu0 }
 0x5c1   : > { %v8782_v23 = vpop.f32.mrb[12].mxu0 }
 0x5c2   : > { %v8790_v56 = vpop.f32.mrb[13].mxu0 }
 0x5c5   : > { %v8800_v5 = vpop.f32.mrb[14].mxu0 }
 0x5c6   : > { %v8808_v22 = vpop.f32.mrb[15].mxu0 }
 0x5c9   : > { %v6188_v35 = vpop.f32.mrb[16].mxu0 }
 0x5ca   : > { %3806 = vrot.lane.b32.xlu1 %v6188_v35, %s7296_s28  ;;  %v3758_v31 = vpop.f32.mrb[17].mxu0  ;;  %v4087_v35 = vsub.f32 %v8835_v55, %v9257_v41 }
 0x5cb   : > { %3804 = vrot.lane.b32.xlu0 %v3758_v31, %s7296_s28  ;;  %v4094_v31 = vsub.f32 %v8837_v40, %v9256_v52 }
 0x5cc   : > { %v4088_v17 = vand.u32 4294901760, %v4087_v35 }
 0x5cd   : > { %v6191_v6 = vpop.f32.mrb[18].mxu0  ;;  %v4095_v42 = vand.u32 4294901760, %v4094_v31 }
 0x5ce   : > { %3810 = vrot.lane.b32.xlu1 %v6191_v6, %s7296_s28  ;;  %v3770_v47 = vpop.f32.mrb[19].mxu0 }
 0x5cf   : > { %3808 = vrot.lane.b32.xlu0 %v3770_v47, %s7296_s28  ;;  %v8853_v6 = vpack.c.bf16 %v4095_v42, %v4088_v17  ;;  %v4101_v47 = vsub.f32 %v8847_v27, %v9255_v38  ;;  %v8883_v17 = vpack.c.bf16 %v8837_v40, %v8835_v55  ;;  %v8887_v42 = vpack.c.bf16 %v8849_v1, %v8847_v27 }
 0x5d1   : > { %v6194_v34 = vpop.f32.mrb[20].mxu0  ;;  %v4102_v62 = vand.u32 4294901760, %v4101_v47  ;;  %v8891_v47 = vpack.c.bf16 %v8863_v8, %v8861_v9 }
 0x5d2   : > { %3814 = vrot.lane.b32.xlu1 %v6194_v34, %s7296_s28  ;;  %v3782_v58 = vpop.f32.mrb[21].mxu0  ;;  %v4108_v34 = vsub.f32 %v8849_v1, %v9254_v24 }
 0x5d3   : > { %3812 = vrot.lane.b32.xlu0 %v3782_v58, %s7296_s28  ;;  %v9253_v58 = vand.u32 4294901760, %v8861_v9 }
 0x5d4   : > { %v4109_v19 = vand.u32 4294901760, %v4108_v34  ;;  %v8896_v34 = vsub.f32 %v8685_v2, %v3859_v33 }
 0x5d5   : > { %v6197_v7 = vpop.f32.mrb[22].mxu0  ;;  %v4115_v35 = vsub.f32 %v8861_v9, %v9253_v58  ;;  %v8928_v58 = vsub.f32 %v8717_v29, %v3871_v4 }
 0x5d6   : > { %3818 = vrot.lane.b32.xlu1 %v6197_v7, %s7296_s28  ;;  %v3794_v50 = vpop.f32.mrb[23].mxu0  ;;  %v9252_v7 = vand.u32 4294901760, %v8863_v8 }
 0x5d7   : > { %3816 = vrot.lane.b32.xlu0 %v3794_v50, %s7296_s28  ;;  %v8867_v50 = vpack.c.bf16 %v4109_v19, %v4102_v62  ;;  %v4116_v26 = vand.u32 4294901760, %v4115_v35  ;;  %v8901_v62 = vsub.f32 %v8690_v54, %v3862_v59  ;;  %v9261_v19 = vand.u32 4294901760, %v8896_v34 }
 0x5d8   : > { %v4122_v31 = vsub.f32 %v8863_v8, %v9252_v7 }
 0x5d9   : > { %v9260_v35 = vand.u32 4294901760, %v8901_v62  ;;  %v4031_v2 = vsub.f32 %v8896_v34, %v9261_v19 }
 0x5da   : > { %v4123_v45 = vand.u32 4294901760, %v4122_v31  ;;  %v8908_v31 = vsub.f32 %v8696_v20, %v3865_v60 }
 0x5db   : > { %v4038_v54 = vsub.f32 %v8901_v62, %v9260_v35 }
 0x5dc   : > { %v8875_v32 = vpack.c.bf16 %v4123_v45, %v4116_v26  ;;  %v8913_v26 = vsub.f32 %v8701_v3, %v3868_v16  ;;  %v9259_v33 = vand.u32 4294901760, %v8908_v31  ;;  %v4032_v3 = vand.u32 4294901760, %v4031_v2 }
 0x5dd   : > { %v4039_v16 = vand.u32 4294901760, %v4038_v54 }
 0x5de   : > { %v9258_v45 = vand.u32 4294901760, %v8913_v26  ;;  %v4045_v38 = vsub.f32 %v8908_v31, %v9259_v33 }
 0x5df   : > { %v8949_v41 = vpack.c.bf16 %v4039_v16, %v4032_v3  ;;  %v8964_v3 = vsub.f32 %v8738_v39, %v3877_v44 }
 0x5e0   : > { %v4052_v54 = vsub.f32 %v8913_v26, %v9258_v45 }
 0x5e2   : > { %v4053_v19 = vand.u32 4294901760, %v4052_v54 }
 0x63c   : > { %v3807_v59 = vpop.permute.xlu1 %3806 }
 0x63d   : > { %v3821_v20 = vmul.f32 %v3807_v59, %v8196_v48  ;;  %v3805_v60 = vpop.permute.xlu0 %3804  ;;  %v8937_v59 = vsub.f32 %v8722_v49, %v3874_v53  ;;  %v9262_v49 = vand.u32 4294901760, %v8928_v58 }
 0x63e   : > { %v3820_v7 = vmul.f32 %v3805_v60, %v8196_v48 }
 0x63f   : > { %v3829_v24 = vadd.f32 %v8766_v0, %v3821_v20  ;;  %v9265_v45 = vand.u32 4294901760, %v8937_v59  ;;  %v4059_v39 = vsub.f32 %v8928_v58, %v9262_v49 }
 0x640   : > { %v3828_v60 = vadd.f32 %v3820_v7, %v8768_v28  ;;  %v3811_v2 = vpop.permute.xlu1 %3810  ;;  %v4046_v7 = vand.u32 4294901760, %v4045_v38 }
 0x641   : > { %v8943_v29 = vand.u32 4294901760, %v3829_v24  ;;  %v3823_v4 = vmul.f32 %v3811_v2, %v8196_v48  ;;  %v3809_v0 = vpop.permute.xlu0 %3808 }
 0x642   : > { %v8946_v20 = vand.u32 4294901760, %v3828_v60  ;;  %v3822_v52 = vmul.f32 %v3809_v0, %v8196_v48 }
 0x643   : > { %v8953_v53 = vsub.f32 %v3829_v24, %v8943_v29  ;;  %v3831_v28 = vadd.f32 %v8770_v14, %v3823_v4 }
 0x644   : > { %v8958_v33 = vsub.f32 %v3828_v60, %v8946_v20  ;;  %v3830_v2 = vadd.f32 %v3822_v52, %v8778_v36  ;;  %v3815_v35 = vpop.permute.xlu1 %3814  ;;  %v8973_v60 = vsub.f32 %v8743_v10, %v3880_v57  ;;  %v4066_v57 = vsub.f32 %v8937_v59, %v9265_v45 }
 0x645   : > { %v9263_v24 = vand.u32 4294901760, %v8953_v53  ;;  %v8967_v16 = vand.u32 4294901760, %v3831_v28  ;;  %v3825_v14 = vmul.f32 %v3815_v35, %v8196_v48  ;;  %v3813_v38 = vpop.permute.xlu0 %3812 }
 0x646   : > { %v8975_v36 = vand.u32 4294901760, %v3830_v2  ;;  %v3824_v52 = vmul.f32 %v3813_v38, %v8196_v48  ;;  %v9268_v54 = vand.u32 4294901760, %v8958_v33 }
 0x647   : > { %v3946_v44 = vsub.f32 %v8953_v53, %v9263_v24  ;;  %v8986_v35 = vsub.f32 %v3831_v28, %v8967_v16  ;;  %v3833_v10 = vadd.f32 %v8782_v23, %v3825_v14 }
 0x648   : > { %v8993_v4 = vsub.f32 %v3830_v2, %v8975_v36  ;;  %v3832_v0 = vadd.f32 %v3824_v52, %v8790_v56  ;;  %v3819_v38 = vpop.permute.xlu1 %3818  ;;  %v3936_v49 = vsub.f32 %v8958_v33, %v9268_v54 }
 0x649   : > { %v9000_v28 = vand.u32 4294901760, %v3833_v10  ;;  %v3827_v23 = vmul.f32 %v3819_v38, %v8196_v48  ;;  %v3817_v14 = vpop.permute.xlu0 %3816  ;;  %v9271_v46 = vand.u32 4294901760, %v8986_v35  ;;  %v3947_v8 = vand.u32 4294901760, %v3946_v44 }
 0x64a   : > { %v9005_v2 = vand.u32 4294901760, %v3832_v0  ;;  %v3826_v56 = vmul.f32 %v3817_v14, %v8196_v48  ;;  %v3937_v52 = vand.u32 4294901760, %v3936_v49  ;;  %v3955_v43 = vand.u32 4294901760, %v8993_v4 }
 0x64b   : > { %v9010_v54 = vsub.f32 %v3833_v10, %v9000_v28  ;;  %v3835_v24 = vadd.f32 %v8800_v5, %v3827_v23  ;;  %v3966_v38 = vsub.f32 %v8986_v35, %v9271_v46  ;;  %v6886_v49 = vpack.c.bf16 %v4053_v19, %v4046_v7 }
 0x64c   : > { %v9017_v9 = vsub.f32 %v3832_v0, %v9005_v2  ;;  %v3834_v45 = vadd.f32 %v3826_v56, %v8808_v22  ;;  %6230 = vmatprep.mubr.f32.mxu1 %v3937_v52  ;;  %v3956_v48 = vsub.f32 %v8993_v4, %v3955_v43  ;;  %v4060_v10 = vand.u32 4294901760, %v4059_v39 }
 0x64d   : > { %v9023_v44 = vand.u32 4294901760, %v3835_v24  ;;  %6231 = vmatmul.mubr.f32.vlgmr.msra.gmra.mrb[16].mxu1 %v3947_v8  ;;  %v9270_v5 = vand.u32 4294901760, %v9010_v54  ;;  %v4067_v23 = vand.u32 4294901760, %v4066_v57  ;;  %v9324_v56 = vand.u32 4294901760, %v8964_v3 }
 0x64e   : > { %v9026_v14 = vand.u32 4294901760, %v3834_v45  ;;  %6881 = vmatpush3.bf16.msra.mxu1 %v8826_v30  ;;  %v3957_v0 = vand.u32 4294901760, %v3956_v48  ;;  %v9272_v22 = vand.u32 4294901760, %v9017_v9  ;;  %v3967_v8 = vand.u32 4294901760, %v3966_v38 }
 0x64f   : > { %v4073_v52 = vsub.f32 %v8964_v3, %v9324_v56  ;;  %v9034_v19 = vsub.f32 %v3835_v24, %v9023_v44  ;;  %6883 = vmatprep.subr.bf16.mxu1 %v8949_v41  ;;  %v3986_v7 = vsub.f32 %v9010_v54, %v9270_v5  ;;  %v9325_v39 = vand.u32 4294901760, %v8973_v60 }
 0x650   : > { %v9044_v57 = vsub.f32 %v3834_v45, %v9026_v14  ;;  %6233 = vmatprep.mubr.f32.mxu1 %v3957_v0  ;;  %v3976_v24 = vsub.f32 %v9017_v9, %v9272_v22  ;;  %v6890_v5 = vpack.c.bf16 %v4067_v23, %v4060_v10  ;;  %v9331_v10 = vand.u32 4294901760, %v8953_v53 }
 0x651   : > { %v4080_v30 = vsub.f32 %v8973_v60, %v9325_v39  ;;  %6234 = vmatmul.mubr.f32.gmra.mrb[18].mxu1 %v3967_v8  ;;  %v4005_v48 = vand.u32 4294901760, %v9034_v19  ;;  %v3987_v46 = vand.u32 4294901760, %v3986_v7  ;;  %v4074_v0 = vand.u32 4294901760, %v4073_v52  ;;  %v9345_v52 = vld [vmem:[#allocation8_spill] sm:$0xff]  ;;  %v9347_v7 = vld [vmem:[#allocation2_spill] sm:$0xff] }
 0x652   : > { %6885 = vmatpush3.bf16.msra.mxu1 %v8949_v41  ;;  %v3977_v38 = vand.u32 4294901760, %v3976_v24  ;;  %v3995_v56 = vand.u32 4294901760, %v9044_v57 }
 0x653   : > { %6887 = vmatprep.subr.bf16.mxu1 %v6886_v49  ;;  %v4006_v45 = vsub.f32 %v9034_v19, %v4005_v48  ;;  %v4081_v39 = vand.u32 4294901760, %v4080_v30  ;;  %v9348_v30 = vand.u32 4294901760, %v9347_v7 }
 0x654   : > { %6236 = vmatprep.mubr.f32.mxu1 %v3977_v38  ;;  %v3996_v8 = vsub.f32 %v9044_v57, %v3995_v56 }
 0x655   : > { %6237 = vmatmul.mubr.f32.gmra.mrb[20].mxu1 %v3987_v46  ;;  %v4007_v24 = vand.u32 4294901760, %v4006_v45  ;;  %v6894_v22 = vpack.c.bf16 %v4081_v39, %v4074_v0  ;;  %v6914_v46 = vpack.c.bf16 %v8901_v62, %v8896_v34 }
 0x656   : > { %6889 = vmatpush3.bf16.msra.mxu1 %v6886_v49  ;;  %v3997_v41 = vand.u32 4294901760, %v3996_v8  ;;  %v9330_v49 = vand.u32 4294901760, %v8901_v62  ;;  %v9336_v62 = vand.u32 4294901760, %v8928_v58 }
 0x657   : > { %6891 = vmatprep.subr.bf16.mxu1 %v6890_v5 }
 0x658   : > { %6239 = vmatprep.mubr.f32.mxu1 %v3997_v41 }
 0x659   : > { %6240 = vmatmul.mubr.f32.gmra.mrb[22].mxu1 %v4007_v24 }
 0x65a   : > { %6893 = vmatpush3.bf16.msra.mxu1 %v6890_v5  ;;  %6274 = vmatprep.mubr.f32.mxu1 %v8946_v20 }
 0x65b   : > { %6895 = vmatprep.subr.bf16.mxu1 %v6894_v22 }
 0x65e   : > { %6897 = vmatpush3.bf16.msra.mxu1 %v6894_v22  ;;  %v9334_v22 = vand.u32 4294901760, %v8986_v35 }
 0x65f   : > { %6899 = vmatprep.subr.bf16.mxu1 %v8853_v6 }
 0x662   : > { %6901 = vmatpush3.bf16.msra.mxu1 %v8853_v6  ;;  %v6918_v6 = vpack.c.bf16 %v8913_v26, %v8908_v31 }
 0x663   : > { %6903 = vmatprep.subr.bf16.mxu1 %v8867_v50 }
 0x666   : > { %6905 = vmatpush3.bf16.msra.mxu1 %v8867_v50  ;;  %v6922_v50 = vpack.c.bf16 %v8937_v59, %v8928_v58  ;;  %v9341_v58 = vand.u32 4294901760, %v8835_v55 }
 0x667   : > { %6907 = vmatprep.subr.bf16.mxu1 %v8875_v32 }
 0x66a   : > { %6909 = vmatpush3.bf16.msra.mxu1 %v8875_v32  ;;  %v6926_v32 = vpack.c.bf16 %v8973_v60, %v8964_v3 }
 0x66b   : > { %6911 = vmatprep.subr.bf16.mxu1 %v8879_v61 }
 0x66d   : > { %6275 = vmatmul.mubr.f32.vlgmr.msra.gmra.mrb[16].mxu1 %v8943_v29 }
 0x66e   : > { %6277 = vmatprep.mubr.f32.mxu1 %v8975_v36  ;;  %6913 = vmatpush3.bf16.msra.mxu1 %v8879_v61  ;;  %v9326_v61 = vand.u32 4294901760, %v8958_v33 }
 0x66f   : > { %6915 = vmatprep.subr.bf16.mxu1 %v6914_v46 }
 0x671   : > { %6278 = vmatmul.mubr.f32.gmra.mrb[18].mxu1 %v8967_v16 }
 0x672   : > { %6280 = vmatprep.mubr.f32.mxu1 %v9005_v2  ;;  %6917 = vmatpush3.bf16.msra.mxu1 %v6914_v46 }
 0x673   : > { %6919 = vmatprep.subr.bf16.mxu1 %v6918_v6 }
 0x675   : > { %6281 = vmatmul.mubr.f32.gmra.mrb[20].mxu1 %v9000_v28 }
 0x676   : > { %6283 = vmatprep.mubr.f32.mxu1 %v9026_v14  ;;  %6921 = vmatpush3.bf16.msra.mxu1 %v6918_v6 }
 0x677   : > { %6923 = vmatprep.subr.bf16.mxu1 %v6922_v50 }
 0x679   : > { %6284 = vmatmul.mubr.f32.gmra.mrb[22].mxu1 %v9023_v44 }
 0x67a   : > { %6925 = vmatpush3.bf16.msra.mxu1 %v6922_v50  ;;  %6318 = vmatprep.mubr.f32.mxu1 %v8958_v33  ;;  %v9329_v33 = vand.u32 4294901760, %v8896_v34  ;;  %v9335_v34 = vand.u32 4294901760, %v9017_v9 }
 0x67b   : > { %6927 = vmatprep.subr.bf16.mxu1 %v6926_v32 }
 0x67c   : > { %v6978_v5 = vpack.c.bf16 %v9330_v49, %v9329_v33 }
 0x67e   : > { %6929 = vmatpush3.bf16.msra.mxu1 %v6926_v32 }
 0x67f   : > { %6931 = vmatprep.subr.bf16.mxu1 %v8883_v17 }
 0x682   : > { %6933 = vmatpush3.bf16.msra.mxu1 %v8883_v17  ;;  %v9327_v17 = vand.u32 4294901760, %v8796_v51  ;;  %v9332_v51 = vand.u32 4294901760, %v8908_v31  ;;  %v9339_v31 = vand.u32 4294901760, %v8964_v3  ;;  %v9344_v3 = vand.u32 4294901760, %v8849_v1 }
 0x683   : > { %6935 = vmatprep.subr.bf16.mxu1 %v8887_v42 }
 0x686   : > { %6937 = vmatpush3.bf16.msra.mxu1 %v8887_v42  ;;  %v9328_v42 = vand.u32 4294901760, %v8798_v12  ;;  %v9333_v12 = vand.u32 4294901760, %v8913_v26 }
 0x687   : > { %6939 = vmatprep.subr.bf16.mxu1 %v8891_v47 }
 0x688   : > { %v6982_v23 = vpack.c.bf16 %v9333_v12, %v9332_v51 }
 0x68a   : > { %6941 = vmatpush3.bf16.msra.mxu1 %v8891_v47  ;;  %v6974_v47 = vpack.c.bf16 %v9328_v42, %v9327_v17 }
 0x68b   : > { %6943 = vmatprep.subr.bf16.mxu1 %v8704_v15 }
 0x68d   : > { %6319 = vmatmul.mubr.f32.vlgmr.msra.gmra.mrb[16].mxu1 %v8953_v53  ;;  %v9337_v53 = vand.u32 4294901760, %v8937_v59  ;;  %v9342_v59 = vand.u32 4294901760, %v8837_v40 }
 0x68e   : > { %6321 = vmatprep.mubr.f32.mxu1 %v8993_v4  ;;  %6945 = vmatpush3.bf16.msra.mxu1 %v8704_v15  ;;  %v9338_v4 = vand.u32 4294901760, %v9010_v54 }
 0x68f   : > { %6947 = vmatprep.subr.bf16.mxu1 %v8712_v63 }
 0x691   : > { %6322 = vmatmul.mubr.f32.gmra.mrb[18].mxu1 %v8986_v35  ;;  %v9343_v35 = vand.u32 4294901760, %v8847_v27 }
 0x692   : > { %6324 = vmatprep.mubr.f32.mxu1 %v9017_v9  ;;  %6949 = vmatpush3.bf16.msra.mxu1 %v8712_v63  ;;  %v9340_v9 = vand.u32 4294901760, %v8973_v60 }
 0x693   : > { %6951 = vmatprep.subr.bf16.mxu1 %v8731_v13  ;;  %v6998_v60 = vpack.c.bf16 %v9344_v3, %v9343_v35 }
 0x694   : > { %v6990_v26 = vpack.c.bf16 %v9340_v9, %v9339_v31 }
 0x695   : > { %6325 = vmatmul.mubr.f32.gmra.mrb[20].mxu1 %v9010_v54  ;;  %v6994_v54 = vpack.c.bf16 %v9342_v59, %v9341_v58 }
 0x696   : > { %6327 = vmatprep.mubr.f32.mxu1 %v9044_v57  ;;  %6953 = vmatpush3.bf16.msra.mxu1 %v8731_v13 }
 0x697   : > { %6955 = vmatprep.subr.bf16.mxu1 %v8751_v18 }
 0x699   : > { %6328 = vmatmul.mubr.f32.gmra.mrb[22].mxu1 %v9034_v19  ;;  %v9346_v19 = vand.u32 4294901760, %v9345_v52 }
 0x69a   : > { %6957 = vmatpush3.bf16.msra.mxu1 %v8751_v18  ;;  %6362 = vmatprep.mubr.f32.mxu1 %v9326_v61 }
 0x69b   : > { %6959 = vmatprep.subr.bf16.mxu1 %v8761_v21  ;;  %v7002_v57 = vpack.c.bf16 %v9348_v30, %v9346_v19 }
 0x69e   : > { %6961 = vmatpush3.bf16.msra.mxu1 %v8761_v21 }
 0x69f   : > { %6963 = vmatprep.subr.bf16.mxu1 %v8780_v37 }
 0x6a2   : > { %6965 = vmatpush3.bf16.msra.mxu1 %v8780_v37 }
 0x6a3   : > { %6967 = vmatprep.subr.bf16.mxu1 %v8794_v25 }
 0x6a6   : > { %6969 = vmatpush3.bf16.msra.mxu1 %v8794_v25 }
 0x6a7   : > { %6971 = vmatprep.subr.bf16.mxu1 %v8814_v11 }
 0x6aa   : > { %6973 = vmatpush3.bf16.msra.mxu1 %v8814_v11 }
 0x6ab   : > { %6975 = vmatprep.subr.bf16.mxu1 %v6974_v47 }
 0x6ad   : > { %6363 = vmatmul.mubr.f32.vlgmr.msra.gmra.mrb[16].mxu1 %v9331_v10 }
 0x6ae   : > { %6365 = vmatprep.mubr.f32.mxu1 %v3955_v43  ;;  %6977 = vmatpush3.bf16.msra.mxu1 %v6974_v47  ;;  %v6986_v43 = vpack.c.bf16 %v9337_v53, %v9336_v62 }
 0x6af   : > { %6979 = vmatprep.subr.bf16.mxu1 %v6978_v5 }
 0x6b1   : > { %6366 = vmatmul.mubr.f32.gmra.mrb[18].mxu1 %v9334_v22 }
 0x6b2   : > { %6368 = vmatprep.mubr.f32.mxu1 %v9335_v34  ;;  %6981 = vmatpush3.bf16.msra.mxu1 %v6978_v5 }
 0x6b3   : > { %6983 = vmatprep.subr.bf16.mxu1 %v6982_v23 }
 0x6b5   : > { %6369 = vmatmul.mubr.f32.gmra.mrb[20].mxu1 %v9338_v4 }
 0x6b6   : > { %6371 = vmatprep.mubr.f32.mxu1 %v3995_v56  ;;  %6985 = vmatpush3.bf16.msra.mxu1 %v6982_v23 }
 0x6b7   : > { %6987 = vmatprep.subr.bf16.mxu1 %v6986_v43 }
 0x6b9   : > { %6372 = vmatmul.mubr.f32.gmra.mrb[22].mxu1 %v4005_v48 }
 0x6ba   : > { %6989 = vmatpush3.bf16.msra.mxu1 %v6986_v43  ;;  %6406 = vmatprep.mubr.f32.mxu1 %v8946_v20 }
 0x6bb   : > { %6991 = vmatprep.subr.bf16.mxu1 %v6990_v26 }
 0x6be   : > { %6993 = vmatpush3.bf16.msra.mxu1 %v6990_v26 }
 0x6bf   : > { %6995 = vmatprep.subr.bf16.mxu1 %v6994_v54 }
 0x6c2   : > { %6997 = vmatpush3.bf16.msra.mxu1 %v6994_v54 }
 0x6c3   : > { %6999 = vmatprep.subr.bf16.mxu1 %v6998_v60 }
 0x6c6   : > { %7001 = vmatpush3.bf16.msra.mxu1 %v6998_v60 }
 0x6c7   : > { %7003 = vmatprep.subr.bf16.mxu1 %v7002_v57 }
 0x6ca   : > { %7005 = vmatpush3.bf16.msra.mxu1 %v7002_v57 }
 0x6cb   : > { %7007 = vmatprep.subr.bf16.mxu1 %v8704_v15 }
 0x6cd   : > { %6407 = vmatmul.mubr.f32.vlgmr.msra.gmra.mrb[16].mxu1 %v8943_v29 }
 0x6ce   : > { %6409 = vmatprep.mubr.f32.mxu1 %v8975_v36  ;;  %7009 = vmatpush3.bf16.msra.mxu1 %v8704_v15 }
 0x6cf   : > { %7011 = vmatprep.subr.bf16.mxu1 %v8712_v63 }
 0x6d1   : > { %6410 = vmatmul.mubr.f32.gmra.mrb[18].mxu1 %v8967_v16 }
 0x6d2   : > { %6412 = vmatprep.mubr.f32.mxu1 %v9005_v2  ;;  %7013 = vmatpush3.bf16.msra.mxu1 %v8712_v63 }
 0x6d3   : > { %7015 = vmatprep.subr.bf16.mxu1 %v8731_v13 }
 0x6d5   : > { %6413 = vmatmul.mubr.f32.gmra.mrb[20].mxu1 %v9000_v28 }
 0x6d6   : > { %6415 = vmatprep.mubr.f32.mxu1 %v9026_v14  ;;  %7017 = vmatpush3.bf16.msra.mxu1 %v8731_v13 }
 0x6d7   : > { %7019 = vmatprep.subr.bf16.mxu1 %v8751_v18 }
 0x6d9   : > { %6416 = vmatmul.mubr.f32.gmra.mrb[22].mxu1 %v9023_v44 }
 0x6da   : > { %7021 = vmatpush3.bf16.msra.mxu1 %v8751_v18  ;;  %6450 = vmatprep.mubr.f32.mxu1 %v8946_v20 }
 0x6db   : > { %7023 = vmatprep.subr.bf16.mxu1 %v8761_v21 }
 0x6de   : > { %7025 = vmatpush3.bf16.msra.mxu1 %v8761_v21 }
 0x6df   : > { %7027 = vmatprep.subr.bf16.mxu1 %v8780_v37 }
 0x6e2   : > { %7029 = vmatpush3.bf16.msra.mxu1 %v8780_v37 }
 0x6e3   : > { %7031 = vmatprep.subr.bf16.mxu1 %v8794_v25 }
 0x6e6   : > { %7033 = vmatpush3.bf16.msra.mxu1 %v8794_v25 }
 0x6e7   : > { %7035 = vmatprep.subr.bf16.mxu1 %v8814_v11 }
 0x6ea   : > { %7037 = vmatpush3.bf16.msra.mxu1 %v8814_v11 }
 0x6ed   : > { %6451 = vmatmul.mubr.f32.vlgmr.msra.gmra.mrb[16].mxu1 %v8943_v29 }
 0x6ee   : > { %6453 = vmatprep.mubr.f32.mxu1 %v8975_v36 }
 0x6f1   : > { %6454 = vmatmul.mubr.f32.gmra.mrb[18].mxu1 %v8967_v16 }
 0x6f2   : > { %6456 = vmatprep.mubr.f32.mxu1 %v9005_v2 }
 0x6f5   : > { %6457 = vmatmul.mubr.f32.gmra.mrb[20].mxu1 %v9000_v28 }
 0x6f6   : > { %6459 = vmatprep.mubr.f32.mxu1 %v9026_v14 }
 0x6f9   : > { %6460 = vmatmul.mubr.f32.gmra.mrb[22].mxu1 %v9023_v44 }
 0x7c0   : > { %v6452_v15 = vpop.f32.mrb[16].mxu1 }
 0x7c1   : > { %4795 = vst [vmem:[%s251_s25 + $0x8] sm:$0xff] %v6452_v15  ;;  %v4748_v63 = vpop.f32.mrb[17].mxu1 }
 0x7c2   : > { %4794 = vst [vmem:[%s251_s25] sm:$0xff] %v4748_v63 }
 0x7c4   : > { %v6455_v13 = vpop.f32.mrb[18].mxu1 }
 0x7c5   : > { %4797 = vst [vmem:[%s251_s25 + $0x18] sm:$0xff] %v6455_v13  ;;  %v4760_v18 = vpop.f32.mrb[19].mxu1 }
 0x7c6   : > { %4796 = vst [vmem:[%s251_s25 + $0x10] sm:$0xff] %v4760_v18 }
 0x7c8   : > { %v6458_v21 = vpop.f32.mrb[20].mxu1 }
 0x7c9   : > { %4799 = vst [vmem:[%s251_s25 + $0x28] sm:$0xff] %v6458_v21  ;;  %v4772_v37 = vpop.f32.mrb[21].mxu1 }
 0x7ca   : > { %4798 = vst [vmem:[%s251_s25 + $0x20] sm:$0xff] %v4772_v37 }
 0x7cc   : > { %v6461_v25 = vpop.f32.mrb[22].mxu1 }
 0x7cd   : > { %4801 = vst [vmem:[%s251_s25 + $0x38] sm:$0xff] %v6461_v25  ;;  %v4784_v11 = vpop.f32.mrb[23].mxu1 }
 0x7ce   : > { %4800 = vst [vmem:[%s251_s25 + $0x30] sm:$0xff] %v4784_v11 }
 0x7cf PF: > { %s16_s21 = sadd.s32 1, %s7294_s21  }
 0x7d0   : > { %p13_p4 = scmp.ge.s32.totalorder %s16_s21, 4  }
 0x7d2   :  { %15 = sbr.rel (!%p13_p4) target bundleno = 1 (0x1), region = 75 }

</bundles_post_ra>
